<compile_context>
chip_gen: v5e
topology: v5e:2x2
jax: 0.10.0
libtpu: 0.0.40
codegen_flags: <defaults>
</compile_context>

<pallas_src>
import functools

import jax
import jax.numpy as jnp
from jax import lax
from jax.experimental import pallas as pl
from jax.experimental.pallas import tpu as pltpu


def _sentence_vector_kernel(ids_ref, emb_ref, out_ref, gbuf_ref, *, tb, seq_len):
    """Fused gather + normalize + masked-mean for one tile of `tb` texts.

    ids_ref : SMEM (B_pad, S) int32   -- scalar-prefetched token ids
    emb_ref : VMEM (V, D)             -- full embedding table (grid-invariant)
    out_ref : VMEM (TB, D) f32        -- sentence vectors for this tile
    gbuf_ref: VMEM (TB, S, D) f32     -- gathered (upcast) token embeddings
    """
    i = pl.program_id(0)

    # In-kernel embedding gather: dynamic row loads out of the VMEM-resident
    # table, scalar indices read from SMEM.  Upcast on load so a bf16-stored
    # table still does all math in f32.
    for b in range(tb):               # static unroll: tb * seq_len small row copies
        for s in range(seq_len):
            tok = ids_ref[i * tb + b, s]
            gbuf_ref[b, s, :] = emb_ref[tok, :].astype(jnp.float32)

    x = gbuf_ref[...]                                        # (TB, S, D) f32
    sq = jnp.sum(x * x, axis=-1, keepdims=True)              # (TB, S, 1) lane reduce
    nonzero = sq > 0.0
    # Clamp sq at 1e-60 (== clamping the norm at 1e-30, matching the reference);
    # exactly-zero rows are masked out by the select below.
    inv_norm = jnp.where(nonzero, lax.rsqrt(jnp.maximum(sq, 1e-60)), 0.0)
    xn = x * inv_norm                                        # L2-normalized word vecs
    summed = jnp.sum(xn, axis=1)                             # (TB, D) sublane reduce
    count = jnp.sum(nonzero.astype(jnp.float32), axis=1)     # (TB, 1)
    denom = jnp.maximum(count, 1.0)                          # fasttext: divide only if count>0
    # EUP reciprocal keeps the final divide off the (shared) VALU slot.
    out_ref[...] = summed * pl.reciprocal(denom, approx=True)


def source_encoder_forward(token_ids, embedding_table, *, tb=8):
    """Sentence embeddings for tokenized texts.

    token_ids:       (B, S) int32
    embedding_table: (V, D) float32 (or bfloat16; upcast in-kernel)
    returns:         (B, D) float32 -- == torch.stack of get_sentence_vector outputs
    """
    token_ids = token_ids.astype(jnp.int32)
    B, S = token_ids.shape
    V, D = embedding_table.shape

    # Pad the batch to a multiple of the tile so every (TB, D) output store is
    # a full, unmasked vst; padded rows are sliced off below.
    b_pad = ((B + tb - 1) // tb) * tb
    if b_pad != B:
        token_ids = jnp.pad(token_ids, ((0, b_pad - B), (0, 0)))

    kernel = functools.partial(_sentence_vector_kernel, tb=tb, seq_len=S)

    itemsize = jnp.dtype(embedding_table.dtype).itemsize
    cost = pl.CostEstimate(
        flops=4 * b_pad * S * D,
        transcendentals=b_pad * S + b_pad,               # rsqrt per token + rcp per text
        bytes_accessed=V * D * itemsize + b_pad * S * 4 + b_pad * D * 4,
    )

    out = pl.pallas_call(
        kernel,
        out_shape=jax.ShapeDtypeStruct((b_pad, D), jnp.float32),
        grid_spec=pltpu.PrefetchScalarGridSpec(
            num_scalar_prefetch=1,                       # token_ids -> SMEM
            grid=(b_pad // tb,),
            in_specs=[
                # Full table resident in VMEM; block index never changes so it
                # is DMA'd from HBM exactly once.  (For very large V, switch to
                # memory_space=pl.ANY + a manual DMA gather instead.)
                pl.BlockSpec((V, D), lambda i, ids: (0, 0)),
            ],
            out_specs=pl.BlockSpec((tb, D), lambda i, ids: (i, 0)),
            scratch_shapes=[pltpu.VMEM((tb, S, D), jnp.float32)],
        ),
        compiler_params=pltpu.CompilerParams(
            # Independent batch tiles -> megacore sharding on v7x.
            dimension_semantics=("parallel",),
            # Raise the scoped-VMEM default (16/32 MiB) so larger tiles fit;
            # 64 MiB is still within the physical floor of every generation.
            vmem_limit_bytes=64 * 1024 * 1024,
        ),
        cost_estimate=cost,
    )(token_ids, embedding_table)

    return out[:B]


def _reference(token_ids, embedding_table):
    x = jnp.take(embedding_table.astype(jnp.float32), token_ids, axis=0)
    n = jnp.linalg.norm(x, axis=-1, keepdims=True)
    xn = jnp.where(n > 0, x / jnp.maximum(n, 1e-30), 0.0)
    cnt = jnp.maximum(
        jnp.sum((n[..., 0] > 0).astype(jnp.float32), axis=1, keepdims=True), 1.0)
    return jnp.sum(xn, axis=1) / cnt


if __name__ == "__main__":
    key = jax.random.PRNGKey(0)
    k_emb, k_ids = jax.random.split(key)

    B, S, V, D = 16, 8, 32, 128   # num_texts, tokens/text, vocab, fasttext dim
    embedding_table = jax.random.normal(k_emb, (V, D), dtype=jnp.float32)
    # Make token id 0 a zero vector to exercise the "skip zero-norm words" path.
    embedding_table = embedding_table.at[0].set(0.0)
    token_ids = jax.random.randint(k_ids, (B, S), 0, V, dtype=jnp.int32)

    out = source_encoder_forward(token_ids, embedding_table, tb=8)
    out = jax.block_until_ready(out)

    ref = _reference(token_ids, embedding_table)
    assert out.shape == (B, D)
    # Loose-ish tolerance only because of the approx (EUP) reciprocal on the
    # per-text count; everything else is exact f32.
    assert jnp.allclose(out, ref, atol=1e-3, rtol=1e-3), float(jnp.max(jnp.abs(out - ref)))
    print("KERNEL_OK")
</pallas_src>

<mosaic_0001>
module attributes {stable_mosaic.version = 11 : i64} {
  func.func @_sentence_vector_kernel(%arg0: i32, %arg1: memref<16x8xi32, #tpu.memory_space<smem>>, %arg2: memref<32x128xf32, #tpu.memory_space<vmem>>, %arg3: memref<8x128xf32, #tpu.memory_space<vmem>>, %arg4: memref<8x8x128xf32, #tpu.memory_space<vmem>>) attributes {dimension_semantics = [#tpu.dimension_semantics<parallel>], iteration_bounds = array<i64: 2>, scalar_prefetch = 1 : i64, scratch_operands = 1 : i64, tpu.core_type = #tpu.core_type<tc>, window_params = [{pipeline_mode = #tpu.pipeline_mode<synchronous>, transform_indices = @transform_0, window_bounds = array<i64: 32, 128>}, {transform_indices = @transform_1, window_bounds = array<i64: 8, 128>}]} {
    %c8_i32 = arith.constant 8 : i32
    %0 = arith.muli %arg0, %c8_i32 : i32
    %c0_i32 = arith.constant 0 : i32
    %1 = arith.addi %0, %c0_i32 : i32
    %2 = arith.index_cast %1 : i32 to index
    %c0 = arith.constant 0 : index
    %3 = memref.load %arg1[%2, %c0] : memref<16x8xi32, #tpu.memory_space<smem>>
    %4 = arith.index_cast %3 : i32 to index
    %c0_0 = arith.constant 0 : index
    %5 = vector.load %arg2[%4, %c0_0] : memref<32x128xf32, #tpu.memory_space<vmem>>, vector<1x128xf32>
    %6 = vector.shape_cast %5 : vector<1x128xf32> to vector<128xf32>
    %c0_1 = arith.constant 0 : index
    %c0_2 = arith.constant 0 : index
    %c0_3 = arith.constant 0 : index
    %7 = vector.load %arg4[%c0_1, %c0_2, %c0_3] : memref<8x8x128xf32, #tpu.memory_space<vmem>>, vector<1x1x128xf32>
    %8 = vector.shape_cast %7 : vector<1x1x128xf32> to vector<128xf32>
    %9 = vector.shape_cast %6 : vector<128xf32> to vector<1x1x128xf32>
    tpu.vector_store %arg4[%c0_1, %c0_2, %c0_3], %9 {strides = array<i32>} : memref<8x8x128xf32, #tpu.memory_space<vmem>>, vector<1x1x128xf32>,
    %c8_i32_4 = arith.constant 8 : i32
    %10 = arith.muli %arg0, %c8_i32_4 : i32
    %c0_i32_5 = arith.constant 0 : i32
    %11 = arith.addi %10, %c0_i32_5 : i32
    %12 = arith.index_cast %11 : i32 to index
    %c1 = arith.constant 1 : index
    %13 = memref.load %arg1[%12, %c1] : memref<16x8xi32, #tpu.memory_space<smem>>
    %14 = arith.index_cast %13 : i32 to index
    %c0_6 = arith.constant 0 : index
    %15 = vector.load %arg2[%14, %c0_6] : memref<32x128xf32, #tpu.memory_space<vmem>>, vector<1x128xf32>
    %16 = vector.shape_cast %15 : vector<1x128xf32> to vector<128xf32>
    %c0_7 = arith.constant 0 : index
    %c1_8 = arith.constant 1 : index
    %c0_9 = arith.constant 0 : index
    %17 = vector.load %arg4[%c0_7, %c1_8, %c0_9] : memref<8x8x128xf32, #tpu.memory_space<vmem>>, vector<1x1x128xf32>
    %18 = vector.shape_cast %17 : vector<1x1x128xf32> to vector<128xf32>
    %19 = vector.shape_cast %16 : vector<128xf32> to vector<1x1x128xf32>
    tpu.vector_store %arg4[%c0_7, %c1_8, %c0_9], %19 {strides = array<i32>} : memref<8x8x128xf32, #tpu.memory_space<vmem>>, vector<1x1x128xf32>,
    %c8_i32_10 = arith.constant 8 : i32
    %20 = arith.muli %arg0, %c8_i32_10 : i32
    %c0_i32_11 = arith.constant 0 : i32
    %21 = arith.addi %20, %c0_i32_11 : i32
    %22 = arith.index_cast %21 : i32 to index
    %c2 = arith.constant 2 : index
    %23 = memref.load %arg1[%22, %c2] : memref<16x8xi32, #tpu.memory_space<smem>>
    %24 = arith.index_cast %23 : i32 to index
    %c0_12 = arith.constant 0 : index
    %25 = vector.load %arg2[%24, %c0_12] : memref<32x128xf32, #tpu.memory_space<vmem>>, vector<1x128xf32>
    %26 = vector.shape_cast %25 : vector<1x128xf32> to vector<128xf32>
    %c0_13 = arith.constant 0 : index
    %c2_14 = arith.constant 2 : index
    %c0_15 = arith.constant 0 : index
    %27 = vector.load %arg4[%c0_13, %c2_14, %c0_15] : memref<8x8x128xf32, #tpu.memory_space<vmem>>, vector<1x1x128xf32>
    %28 = vector.shape_cast %27 : vector<1x1x128xf32> to vector<128xf32>
    %29 = vector.shape_cast %26 : vector<128xf32> to vector<1x1x128xf32>
    tpu.vector_store %arg4[%c0_13, %c2_14, %c0_15], %29 {strides = array<i32>} : memref<8x8x128xf32, #tpu.memory_space<vmem>>, vector<1x1x128xf32>,
    %c8_i32_16 = arith.constant 8 : i32
    %30 = arith.muli %arg0, %c8_i32_16 : i32
    %c0_i32_17 = arith.constant 0 : i32
    %31 = arith.addi %30, %c0_i32_17 : i32
    %32 = arith.index_cast %31 : i32 to index
    %c3 = arith.constant 3 : index
    %33 = memref.load %arg1[%32, %c3] : memref<16x8xi32, #tpu.memory_space<smem>>
    %34 = arith.index_cast %33 : i32 to index
    %c0_18 = arith.constant 0 : index
    %35 = vector.load %arg2[%34, %c0_18] : memref<32x128xf32, #tpu.memory_space<vmem>>, vector<1x128xf32>
    %36 = vector.shape_cast %35 : vector<1x128xf32> to vector<128xf32>
    %c0_19 = arith.constant 0 : index
    %c3_20 = arith.constant 3 : index
    %c0_21 = arith.constant 0 : index
    %37 = vector.load %arg4[%c0_19, %c3_20, %c0_21] : memref<8x8x128xf32, #tpu.memory_space<vmem>>, vector<1x1x128xf32>
    %38 = vector.shape_cast %37 : vector<1x1x128xf32> to vector<128xf32>
    %39 = vector.shape_cast %36 : vector<128xf32> to vector<1x1x128xf32>
    tpu.vector_store %arg4[%c0_19, %c3_20, %c0_21], %39 {strides = array<i32>} : memref<8x8x128xf32, #tpu.memory_space<vmem>>, vector<1x1x128xf32>,
    %c8_i32_22 = arith.constant 8 : i32
    %40 = arith.muli %arg0, %c8_i32_22 : i32
    %c0_i32_23 = arith.constant 0 : i32
    %41 = arith.addi %40, %c0_i32_23 : i32
    %42 = arith.index_cast %41 : i32 to index
    %c4 = arith.constant 4 : index
    %43 = memref.load %arg1[%42, %c4] : memref<16x8xi32, #tpu.memory_space<smem>>
    %44 = arith.index_cast %43 : i32 to index
    %c0_24 = arith.constant 0 : index
    %45 = vector.load %arg2[%44, %c0_24] : memref<32x128xf32, #tpu.memory_space<vmem>>, vector<1x128xf32>
    %46 = vector.shape_cast %45 : vector<1x128xf32> to vector<128xf32>
    %c0_25 = arith.constant 0 : index
    %c4_26 = arith.constant 4 : index
    %c0_27 = arith.constant 0 : index
    %47 = vector.load %arg4[%c0_25, %c4_26, %c0_27] : memref<8x8x128xf32, #tpu.memory_space<vmem>>, vector<1x1x128xf32>
    %48 = vector.shape_cast %47 : vector<1x1x128xf32> to vector<128xf32>
    %49 = vector.shape_cast %46 : vector<128xf32> to vector<1x1x128xf32>
    tpu.vector_store %arg4[%c0_25, %c4_26, %c0_27], %49 {strides = array<i32>} : memref<8x8x128xf32, #tpu.memory_space<vmem>>, vector<1x1x128xf32>,
    %c8_i32_28 = arith.constant 8 : i32
    %50 = arith.muli %arg0, %c8_i32_28 : i32
    %c0_i32_29 = arith.constant 0 : i32
    %51 = arith.addi %50, %c0_i32_29 : i32
    %52 = arith.index_cast %51 : i32 to index
    %c5 = arith.constant 5 : index
    %53 = memref.load %arg1[%52, %c5] : memref<16x8xi32, #tpu.memory_space<smem>>
    %54 = arith.index_cast %53 : i32 to index
    %c0_30 = arith.constant 0 : index
    %55 = vector.load %arg2[%54, %c0_30] : memref<32x128xf32, #tpu.memory_space<vmem>>, vector<1x128xf32>
    %56 = vector.shape_cast %55 : vector<1x128xf32> to vector<128xf32>
    %c0_31 = arith.constant 0 : index
    %c5_32 = arith.constant 5 : index
    %c0_33 = arith.constant 0 : index
    %57 = vector.load %arg4[%c0_31, %c5_32, %c0_33] : memref<8x8x128xf32, #tpu.memory_space<vmem>>, vector<1x1x128xf32>
    %58 = vector.shape_cast %57 : vector<1x1x128xf32> to vector<128xf32>
    %59 = vector.shape_cast %56 : vector<128xf32> to vector<1x1x128xf32>
    tpu.vector_store %arg4[%c0_31, %c5_32, %c0_33], %59 {strides = array<i32>} : memref<8x8x128xf32, #tpu.memory_space<vmem>>, vector<1x1x128xf32>,
    %c8_i32_34 = arith.constant 8 : i32
    %60 = arith.muli %arg0, %c8_i32_34 : i32
    %c0_i32_35 = arith.constant 0 : i32
    %61 = arith.addi %60, %c0_i32_35 : i32
    %62 = arith.index_cast %61 : i32 to index
    %c6 = arith.constant 6 : index
    %63 = memref.load %arg1[%62, %c6] : memref<16x8xi32, #tpu.memory_space<smem>>
    %64 = arith.index_cast %63 : i32 to index
    %c0_36 = arith.constant 0 : index
    %65 = vector.load %arg2[%64, %c0_36] : memref<32x128xf32, #tpu.memory_space<vmem>>, vector<1x128xf32>
    %66 = vector.shape_cast %65 : vector<1x128xf32> to vector<128xf32>
    %c0_37 = arith.constant 0 : index
    %c6_38 = arith.constant 6 : index
    %c0_39 = arith.constant 0 : index
    %67 = vector.load %arg4[%c0_37, %c6_38, %c0_39] : memref<8x8x128xf32, #tpu.memory_space<vmem>>, vector<1x1x128xf32>
    %68 = vector.shape_cast %67 : vector<1x1x128xf32> to vector<128xf32>
    %69 = vector.shape_cast %66 : vector<128xf32> to vector<1x1x128xf32>
    tpu.vector_store %arg4[%c0_37, %c6_38, %c0_39], %69 {strides = array<i32>} : memref<8x8x128xf32, #tpu.memory_space<vmem>>, vector<1x1x128xf32>,
    %c8_i32_40 = arith.constant 8 : i32
    %70 = arith.muli %arg0, %c8_i32_40 : i32
    %c0_i32_41 = arith.constant 0 : i32
    %71 = arith.addi %70, %c0_i32_41 : i32
    %72 = arith.index_cast %71 : i32 to index
    %c7 = arith.constant 7 : index
    %73 = memref.load %arg1[%72, %c7] : memref<16x8xi32, #tpu.memory_space<smem>>
    %74 = arith.index_cast %73 : i32 to index
    %c0_42 = arith.constant 0 : index
    %75 = vector.load %arg2[%74, %c0_42] : memref<32x128xf32, #tpu.memory_space<vmem>>, vector<1x128xf32>
    %76 = vector.shape_cast %75 : vector<1x128xf32> to vector<128xf32>
    %c0_43 = arith.constant 0 : index
    %c7_44 = arith.constant 7 : index
    %c0_45 = arith.constant 0 : index
    %77 = vector.load %arg4[%c0_43, %c7_44, %c0_45] : memref<8x8x128xf32, #tpu.memory_space<vmem>>, vector<1x1x128xf32>
    %78 = vector.shape_cast %77 : vector<1x1x128xf32> to vector<128xf32>
    %79 = vector.shape_cast %76 : vector<128xf32> to vector<1x1x128xf32>
    tpu.vector_store %arg4[%c0_43, %c7_44, %c0_45], %79 {strides = array<i32>} : memref<8x8x128xf32, #tpu.memory_space<vmem>>, vector<1x1x128xf32>,
    %c8_i32_46 = arith.constant 8 : i32
    %80 = arith.muli %arg0, %c8_i32_46 : i32
    %c1_i32 = arith.constant 1 : i32
    %81 = arith.addi %80, %c1_i32 : i32
    %82 = arith.index_cast %81 : i32 to index
    %c0_47 = arith.constant 0 : index
    %83 = memref.load %arg1[%82, %c0_47] : memref<16x8xi32, #tpu.memory_space<smem>>
    %84 = arith.index_cast %83 : i32 to index
    %c0_48 = arith.constant 0 : index
    %85 = vector.load %arg2[%84, %c0_48] : memref<32x128xf32, #tpu.memory_space<vmem>>, vector<1x128xf32>
    %86 = vector.shape_cast %85 : vector<1x128xf32> to vector<128xf32>
    %c1_49 = arith.constant 1 : index
    %c0_50 = arith.constant 0 : index
    %c0_51 = arith.constant 0 : index
    %87 = vector.load %arg4[%c1_49, %c0_50, %c0_51] : memref<8x8x128xf32, #tpu.memory_space<vmem>>, vector<1x1x128xf32>
    %88 = vector.shape_cast %87 : vector<1x1x128xf32> to vector<128xf32>
    %89 = vector.shape_cast %86 : vector<128xf32> to vector<1x1x128xf32>
    tpu.vector_store %arg4[%c1_49, %c0_50, %c0_51], %89 {strides = array<i32>} : memref<8x8x128xf32, #tpu.memory_space<vmem>>, vector<1x1x128xf32>,
    %c8_i32_52 = arith.constant 8 : i32
    %90 = arith.muli %arg0, %c8_i32_52 : i32
    %c1_i32_53 = arith.constant 1 : i32
    %91 = arith.addi %90, %c1_i32_53 : i32
    %92 = arith.index_cast %91 : i32 to index
    %c1_54 = arith.constant 1 : index
    %93 = memref.load %arg1[%92, %c1_54] : memref<16x8xi32, #tpu.memory_space<smem>>
    %94 = arith.index_cast %93 : i32 to index
    %c0_55 = arith.constant 0 : index
    %95 = vector.load %arg2[%94, %c0_55] : memref<32x128xf32, #tpu.memory_space<vmem>>, vector<1x128xf32>
    %96 = vector.shape_cast %95 : vector<1x128xf32> to vector<128xf32>
    %c1_56 = arith.constant 1 : index
    %c1_57 = arith.constant 1 : index
    %c0_58 = arith.constant 0 : index
    %97 = vector.load %arg4[%c1_56, %c1_57, %c0_58] : memref<8x8x128xf32, #tpu.memory_space<vmem>>, vector<1x1x128xf32>
    %98 = vector.shape_cast %97 : vector<1x1x128xf32> to vector<128xf32>
    %99 = vector.shape_cast %96 : vector<128xf32> to vector<1x1x128xf32>
    tpu.vector_store %arg4[%c1_56, %c1_57, %c0_58], %99 {strides = array<i32>} : memref<8x8x128xf32, #tpu.memory_space<vmem>>, vector<1x1x128xf32>,
    %c8_i32_59 = arith.constant 8 : i32
    %100 = arith.muli %arg0, %c8_i32_59 : i32
    %c1_i32_60 = arith.constant 1 : i32
    %101 = arith.addi %100, %c1_i32_60 : i32
    %102 = arith.index_cast %101 : i32 to index
    %c2_61 = arith.constant 2 : index
    %103 = memref.load %arg1[%102, %c2_61] : memref<16x8xi32, #tpu.memory_space<smem>>
    %104 = arith.index_cast %103 : i32 to index
    %c0_62 = arith.constant 0 : index
    %105 = vector.load %arg2[%104, %c0_62] : memref<32x128xf32, #tpu.memory_space<vmem>>, vector<1x128xf32>
    %106 = vector.shape_cast %105 : vector<1x128xf32> to vector<128xf32>
    %c1_63 = arith.constant 1 : index
    %c2_64 = arith.constant 2 : index
    %c0_65 = arith.constant 0 : index
    %107 = vector.load %arg4[%c1_63, %c2_64, %c0_65] : memref<8x8x128xf32, #tpu.memory_space<vmem>>, vector<1x1x128xf32>
    %108 = vector.shape_cast %107 : vector<1x1x128xf32> to vector<128xf32>
    %109 = vector.shape_cast %106 : vector<128xf32> to vector<1x1x128xf32>
    tpu.vector_store %arg4[%c1_63, %c2_64, %c0_65], %109 {strides = array<i32>} : memref<8x8x128xf32, #tpu.memory_space<vmem>>, vector<1x1x128xf32>,
    %c8_i32_66 = arith.constant 8 : i32
    %110 = arith.muli %arg0, %c8_i32_66 : i32
    %c1_i32_67 = arith.constant 1 : i32
    %111 = arith.addi %110, %c1_i32_67 : i32
    %112 = arith.index_cast %111 : i32 to index
    %c3_68 = arith.constant 3 : index
    %113 = memref.load %arg1[%112, %c3_68] : memref<16x8xi32, #tpu.memory_space<smem>>
    %114 = arith.index_cast %113 : i32 to index
    %c0_69 = arith.constant 0 : index
    %115 = vector.load %arg2[%114, %c0_69] : memref<32x128xf32, #tpu.memory_space<vmem>>, vector<1x128xf32>
    %116 = vector.shape_cast %115 : vector<1x128xf32> to vector<128xf32>
    %c1_70 = arith.constant 1 : index
    %c3_71 = arith.constant 3 : index
    %c0_72 = arith.constant 0 : index
    %117 = vector.load %arg4[%c1_70, %c3_71, %c0_72] : memref<8x8x128xf32, #tpu.memory_space<vmem>>, vector<1x1x128xf32>
    %118 = vector.shape_cast %117 : vector<1x1x128xf32> to vector<128xf32>
    %119 = vector.shape_cast %116 : vector<128xf32> to vector<1x1x128xf32>
    tpu.vector_store %arg4[%c1_70, %c3_71, %c0_72], %119 {strides = array<i32>} : memref<8x8x128xf32, #tpu.memory_space<vmem>>, vector<1x1x128xf32>,
    %c8_i32_73 = arith.constant 8 : i32
    %120 = arith.muli %arg0, %c8_i32_73 : i32
    %c1_i32_74 = arith.constant 1 : i32
    %121 = arith.addi %120, %c1_i32_74 : i32
    %122 = arith.index_cast %121 : i32 to index
    %c4_75 = arith.constant 4 : index
    %123 = memref.load %arg1[%122, %c4_75] : memref<16x8xi32, #tpu.memory_space<smem>>
    %124 = arith.index_cast %123 : i32 to index
    %c0_76 = arith.constant 0 : index
    %125 = vector.load %arg2[%124, %c0_76] : memref<32x128xf32, #tpu.memory_space<vmem>>, vector<1x128xf32>
    %126 = vector.shape_cast %125 : vector<1x128xf32> to vector<128xf32>
    %c1_77 = arith.constant 1 : index
    %c4_78 = arith.constant 4 : index
    %c0_79 = arith.constant 0 : index
    %127 = vector.load %arg4[%c1_77, %c4_78, %c0_79] : memref<8x8x128xf32, #tpu.memory_space<vmem>>, vector<1x1x128xf32>
    %128 = vector.shape_cast %127 : vector<1x1x128xf32> to vector<128xf32>
    %129 = vector.shape_cast %126 : vector<128xf32> to vector<1x1x128xf32>
    tpu.vector_store %arg4[%c1_77, %c4_78, %c0_79], %129 {strides = array<i32>} : memref<8x8x128xf32, #tpu.memory_space<vmem>>, vector<1x1x128xf32>,
    %c8_i32_80 = arith.constant 8 : i32
    %130 = arith.muli %arg0, %c8_i32_80 : i32
    %c1_i32_81 = arith.constant 1 : i32
    %131 = arith.addi %130, %c1_i32_81 : i32
    %132 = arith.index_cast %131 : i32 to index
    %c5_82 = arith.constant 5 : index
    %133 = memref.load %arg1[%132, %c5_82] : memref<16x8xi32, #tpu.memory_space<smem>>
    %134 = arith.index_cast %133 : i32 to index
    %c0_83 = arith.constant 0 : index
    %135 = vector.load %arg2[%134, %c0_83] : memref<32x128xf32, #tpu.memory_space<vmem>>, vector<1x128xf32>
    %136 = vector.shape_cast %135 : vector<1x128xf32> to vector<128xf32>
    %c1_84 = arith.constant 1 : index
    %c5_85 = arith.constant 5 : index
    %c0_86 = arith.constant 0 : index
    %137 = vector.load %arg4[%c1_84, %c5_85, %c0_86] : memref<8x8x128xf32, #tpu.memory_space<vmem>>, vector<1x1x128xf32>
    %138 = vector.shape_cast %137 : vector<1x1x128xf32> to vector<128xf32>
    %139 = vector.shape_cast %136 : vector<128xf32> to vector<1x1x128xf32>
    tpu.vector_store %arg4[%c1_84, %c5_85, %c0_86], %139 {strides = array<i32>} : memref<8x8x128xf32, #tpu.memory_space<vmem>>, vector<1x1x128xf32>,
    %c8_i32_87 = arith.constant 8 : i32
    %140 = arith.muli %arg0, %c8_i32_87 : i32
    %c1_i32_88 = arith.constant 1 : i32
    %141 = arith.addi %140, %c1_i32_88 : i32
    %142 = arith.index_cast %141 : i32 to index
    %c6_89 = arith.constant 6 : index
    %143 = memref.load %arg1[%142, %c6_89] : memref<16x8xi32, #tpu.memory_space<smem>>
    %144 = arith.index_cast %143 : i32 to index
    %c0_90 = arith.constant 0 : index
    %145 = vector.load %arg2[%144, %c0_90] : memref<32x128xf32, #tpu.memory_space<vmem>>, vector<1x128xf32>
    %146 = vector.shape_cast %145 : vector<1x128xf32> to vector<128xf32>
    %c1_91 = arith.constant 1 : index
    %c6_92 = arith.constant 6 : index
    %c0_93 = arith.constant 0 : index
    %147 = vector.load %arg4[%c1_91, %c6_92, %c0_93] : memref<8x8x128xf32, #tpu.memory_space<vmem>>, vector<1x1x128xf32>
    %148 = vector.shape_cast %147 : vector<1x1x128xf32> to vector<128xf32>
    %149 = vector.shape_cast %146 : vector<128xf32> to vector<1x1x128xf32>
    tpu.vector_store %arg4[%c1_91, %c6_92, %c0_93], %149 {strides = array<i32>} : memref<8x8x128xf32, #tpu.memory_space<vmem>>, vector<1x1x128xf32>,
    %c8_i32_94 = arith.constant 8 : i32
    %150 = arith.muli %arg0, %c8_i32_94 : i32
    %c1_i32_95 = arith.constant 1 : i32
    %151 = arith.addi %150, %c1_i32_95 : i32
    %152 = arith.index_cast %151 : i32 to index
    %c7_96 = arith.constant 7 : index
    %153 = memref.load %arg1[%152, %c7_96] : memref<16x8xi32, #tpu.memory_space<smem>>
    %154 = arith.index_cast %153 : i32 to index
    %c0_97 = arith.constant 0 : index
    %155 = vector.load %arg2[%154, %c0_97] : memref<32x128xf32, #tpu.memory_space<vmem>>, vector<1x128xf32>
    %156 = vector.shape_cast %155 : vector<1x128xf32> to vector<128xf32>
    %c1_98 = arith.constant 1 : index
    %c7_99 = arith.constant 7 : index
    %c0_100 = arith.constant 0 : index
    %157 = vector.load %arg4[%c1_98, %c7_99, %c0_100] : memref<8x8x128xf32, #tpu.memory_space<vmem>>, vector<1x1x128xf32>
    %158 = vector.shape_cast %157 : vector<1x1x128xf32> to vector<128xf32>
    %159 = vector.shape_cast %156 : vector<128xf32> to vector<1x1x128xf32>
    tpu.vector_store %arg4[%c1_98, %c7_99, %c0_100], %159 {strides = array<i32>} : memref<8x8x128xf32, #tpu.memory_space<vmem>>, vector<1x1x128xf32>,
    %c8_i32_101 = arith.constant 8 : i32
    %160 = arith.muli %arg0, %c8_i32_101 : i32
    %c2_i32 = arith.constant 2 : i32
    %161 = arith.addi %160, %c2_i32 : i32
    %162 = arith.index_cast %161 : i32 to index
    %c0_102 = arith.constant 0 : index
    %163 = memref.load %arg1[%162, %c0_102] : memref<16x8xi32, #tpu.memory_space<smem>>
    %164 = arith.index_cast %163 : i32 to index
    %c0_103 = arith.constant 0 : index
    %165 = vector.load %arg2[%164, %c0_103] : memref<32x128xf32, #tpu.memory_space<vmem>>, vector<1x128xf32>
    %166 = vector.shape_cast %165 : vector<1x128xf32> to vector<128xf32>
    %c2_104 = arith.constant 2 : index
    %c0_105 = arith.constant 0 : index
    %c0_106 = arith.constant 0 : index
    %167 = vector.load %arg4[%c2_104, %c0_105, %c0_106] : memref<8x8x128xf32, #tpu.memory_space<vmem>>, vector<1x1x128xf32>
    %168 = vector.shape_cast %167 : vector<1x1x128xf32> to vector<128xf32>
    %169 = vector.shape_cast %166 : vector<128xf32> to vector<1x1x128xf32>
    tpu.vector_store %arg4[%c2_104, %c0_105, %c0_106], %169 {strides = array<i32>} : memref<8x8x128xf32, #tpu.memory_space<vmem>>, vector<1x1x128xf32>,
    %c8_i32_107 = arith.constant 8 : i32
    %170 = arith.muli %arg0, %c8_i32_107 : i32
    %c2_i32_108 = arith.constant 2 : i32
    %171 = arith.addi %170, %c2_i32_108 : i32
    %172 = arith.index_cast %171 : i32 to index
    %c1_109 = arith.constant 1 : index
    %173 = memref.load %arg1[%172, %c1_109] : memref<16x8xi32, #tpu.memory_space<smem>>
    %174 = arith.index_cast %173 : i32 to index
    %c0_110 = arith.constant 0 : index
    %175 = vector.load %arg2[%174, %c0_110] : memref<32x128xf32, #tpu.memory_space<vmem>>, vector<1x128xf32>
    %176 = vector.shape_cast %175 : vector<1x128xf32> to vector<128xf32>
    %c2_111 = arith.constant 2 : index
    %c1_112 = arith.constant 1 : index
    %c0_113 = arith.constant 0 : index
    %177 = vector.load %arg4[%c2_111, %c1_112, %c0_113] : memref<8x8x128xf32, #tpu.memory_space<vmem>>, vector<1x1x128xf32>
    %178 = vector.shape_cast %177 : vector<1x1x128xf32> to vector<128xf32>
    %179 = vector.shape_cast %176 : vector<128xf32> to vector<1x1x128xf32>
    tpu.vector_store %arg4[%c2_111, %c1_112, %c0_113], %179 {strides = array<i32>} : memref<8x8x128xf32, #tpu.memory_space<vmem>>, vector<1x1x128xf32>,
    %c8_i32_114 = arith.constant 8 : i32
    %180 = arith.muli %arg0, %c8_i32_114 : i32
    %c2_i32_115 = arith.constant 2 : i32
    %181 = arith.addi %180, %c2_i32_115 : i32
    %182 = arith.index_cast %181 : i32 to index
    %c2_116 = arith.constant 2 : index
    %183 = memref.load %arg1[%182, %c2_116] : memref<16x8xi32, #tpu.memory_space<smem>>
    %184 = arith.index_cast %183 : i32 to index
    %c0_117 = arith.constant 0 : index
    %185 = vector.load %arg2[%184, %c0_117] : memref<32x128xf32, #tpu.memory_space<vmem>>, vector<1x128xf32>
    %186 = vector.shape_cast %185 : vector<1x128xf32> to vector<128xf32>
    %c2_118 = arith.constant 2 : index
    %c2_119 = arith.constant 2 : index
    %c0_120 = arith.constant 0 : index
    %187 = vector.load %arg4[%c2_118, %c2_119, %c0_120] : memref<8x8x128xf32, #tpu.memory_space<vmem>>, vector<1x1x128xf32>
    %188 = vector.shape_cast %187 : vector<1x1x128xf32> to vector<128xf32>
    %189 = vector.shape_cast %186 : vector<128xf32> to vector<1x1x128xf32>
    tpu.vector_store %arg4[%c2_118, %c2_119, %c0_120], %189 {strides = array<i32>} : memref<8x8x128xf32, #tpu.memory_space<vmem>>, vector<1x1x128xf32>,
    %c8_i32_121 = arith.constant 8 : i32
    %190 = arith.muli %arg0, %c8_i32_121 : i32
    %c2_i32_122 = arith.constant 2 : i32
    %191 = arith.addi %190, %c2_i32_122 : i32
    %192 = arith.index_cast %191 : i32 to index
    %c3_123 = arith.constant 3 : index
    %193 = memref.load %arg1[%192, %c3_123] : memref<16x8xi32, #tpu.memory_space<smem>>
    %194 = arith.index_cast %193 : i32 to index
    %c0_124 = arith.constant 0 : index
    %195 = vector.load %arg2[%194, %c0_124] : memref<32x128xf32, #tpu.memory_space<vmem>>, vector<1x128xf32>
    %196 = vector.shape_cast %195 : vector<1x128xf32> to vector<128xf32>
    %c2_125 = arith.constant 2 : index
    %c3_126 = arith.constant 3 : index
    %c0_127 = arith.constant 0 : index
    %197 = vector.load %arg4[%c2_125, %c3_126, %c0_127] : memref<8x8x128xf32, #tpu.memory_space<vmem>>, vector<1x1x128xf32>
    %198 = vector.shape_cast %197 : vector<1x1x128xf32> to vector<128xf32>
    %199 = vector.shape_cast %196 : vector<128xf32> to vector<1x1x128xf32>
    tpu.vector_store %arg4[%c2_125, %c3_126, %c0_127], %199 {strides = array<i32>} : memref<8x8x128xf32, #tpu.memory_space<vmem>>, vector<1x1x128xf32>,
    %c8_i32_128 = arith.constant 8 : i32
    %200 = arith.muli %arg0, %c8_i32_128 : i32
    %c2_i32_129 = arith.constant 2 : i32
    %201 = arith.addi %200, %c2_i32_129 : i32
    %202 = arith.index_cast %201 : i32 to index
    %c4_130 = arith.constant 4 : index
    %203 = memref.load %arg1[%202, %c4_130] : memref<16x8xi32, #tpu.memory_space<smem>>
    %204 = arith.index_cast %203 : i32 to index
    %c0_131 = arith.constant 0 : index
    %205 = vector.load %arg2[%204, %c0_131] : memref<32x128xf32, #tpu.memory_space<vmem>>, vector<1x128xf32>
    %206 = vector.shape_cast %205 : vector<1x128xf32> to vector<128xf32>
    %c2_132 = arith.constant 2 : index
    %c4_133 = arith.constant 4 : index
    %c0_134 = arith.constant 0 : index
    %207 = vector.load %arg4[%c2_132, %c4_133, %c0_134] : memref<8x8x128xf32, #tpu.memory_space<vmem>>, vector<1x1x128xf32>
    %208 = vector.shape_cast %207 : vector<1x1x128xf32> to vector<128xf32>
    %209 = vector.shape_cast %206 : vector<128xf32> to vector<1x1x128xf32>
    tpu.vector_store %arg4[%c2_132, %c4_133, %c0_134], %209 {strides = array<i32>} : memref<8x8x128xf32, #tpu.memory_space<vmem>>, vector<1x1x128xf32>,
    %c8_i32_135 = arith.constant 8 : i32
    %210 = arith.muli %arg0, %c8_i32_135 : i32
    %c2_i32_136 = arith.constant 2 : i32
    %211 = arith.addi %210, %c2_i32_136 : i32
    %212 = arith.index_cast %211 : i32 to index
    %c5_137 = arith.constant 5 : index
    %213 = memref.load %arg1[%212, %c5_137] : memref<16x8xi32, #tpu.memory_space<smem>>
    %214 = arith.index_cast %213 : i32 to index
    %c0_138 = arith.constant 0 : index
    %215 = vector.load %arg2[%214, %c0_138] : memref<32x128xf32, #tpu.memory_space<vmem>>, vector<1x128xf32>
    %216 = vector.shape_cast %215 : vector<1x128xf32> to vector<128xf32>
    %c2_139 = arith.constant 2 : index
    %c5_140 = arith.constant 5 : index
    %c0_141 = arith.constant 0 : index
    %217 = vector.load %arg4[%c2_139, %c5_140, %c0_141] : memref<8x8x128xf32, #tpu.memory_space<vmem>>, vector<1x1x128xf32>
    %218 = vector.shape_cast %217 : vector<1x1x128xf32> to vector<128xf32>
    %219 = vector.shape_cast %216 : vector<128xf32> to vector<1x1x128xf32>
    tpu.vector_store %arg4[%c2_139, %c5_140, %c0_141], %219 {strides = array<i32>} : memref<8x8x128xf32, #tpu.memory_space<vmem>>, vector<1x1x128xf32>,
    %c8_i32_142 = arith.constant 8 : i32
    %220 = arith.muli %arg0, %c8_i32_142 : i32
    %c2_i32_143 = arith.constant 2 : i32
    %221 = arith.addi %220, %c2_i32_143 : i32
    %222 = arith.index_cast %221 : i32 to index
    %c6_144 = arith.constant 6 : index
    %223 = memref.load %arg1[%222, %c6_144] : memref<16x8xi32, #tpu.memory_space<smem>>
    %224 = arith.index_cast %223 : i32 to index
    %c0_145 = arith.constant 0 : index
    %225 = vector.load %arg2[%224, %c0_145] : memref<32x128xf32, #tpu.memory_space<vmem>>, vector<1x128xf32>
    %226 = vector.shape_cast %225 : vector<1x128xf32> to vector<128xf32>
    %c2_146 = arith.constant 2 : index
    %c6_147 = arith.constant 6 : index
    %c0_148 = arith.constant 0 : index
    %227 = vector.load %arg4[%c2_146, %c6_147, %c0_148] : memref<8x8x128xf32, #tpu.memory_space<vmem>>, vector<1x1x128xf32>
    %228 = vector.shape_cast %227 : vector<1x1x128xf32> to vector<128xf32>
    %229 = vector.shape_cast %226 : vector<128xf32> to vector<1x1x128xf32>
    tpu.vector_store %arg4[%c2_146, %c6_147, %c0_148], %229 {strides = array<i32>} : memref<8x8x128xf32, #tpu.memory_space<vmem>>, vector<1x1x128xf32>,
    %c8_i32_149 = arith.constant 8 : i32
    %230 = arith.muli %arg0, %c8_i32_149 : i32
    %c2_i32_150 = arith.constant 2 : i32
    %231 = arith.addi %230, %c2_i32_150 : i32
    %232 = arith.index_cast %231 : i32 to index
    %c7_151 = arith.constant 7 : index
    %233 = memref.load %arg1[%232, %c7_151] : memref<16x8xi32, #tpu.memory_space<smem>>
    %234 = arith.index_cast %233 : i32 to index
    %c0_152 = arith.constant 0 : index
    %235 = vector.load %arg2[%234, %c0_152] : memref<32x128xf32, #tpu.memory_space<vmem>>, vector<1x128xf32>
    %236 = vector.shape_cast %235 : vector<1x128xf32> to vector<128xf32>
    %c2_153 = arith.constant 2 : index
    %c7_154 = arith.constant 7 : index
    %c0_155 = arith.constant 0 : index
    %237 = vector.load %arg4[%c2_153, %c7_154, %c0_155] : memref<8x8x128xf32, #tpu.memory_space<vmem>>, vector<1x1x128xf32>
    %238 = vector.shape_cast %237 : vector<1x1x128xf32> to vector<128xf32>
    %239 = vector.shape_cast %236 : vector<128xf32> to vector<1x1x128xf32>
    tpu.vector_store %arg4[%c2_153, %c7_154, %c0_155], %239 {strides = array<i32>} : memref<8x8x128xf32, #tpu.memory_space<vmem>>, vector<1x1x128xf32>,
    %c8_i32_156 = arith.constant 8 : i32
    %240 = arith.muli %arg0, %c8_i32_156 : i32
    %c3_i32 = arith.constant 3 : i32
    %241 = arith.addi %240, %c3_i32 : i32
    %242 = arith.index_cast %241 : i32 to index
    %c0_157 = arith.constant 0 : index
    %243 = memref.load %arg1[%242, %c0_157] : memref<16x8xi32, #tpu.memory_space<smem>>
    %244 = arith.index_cast %243 : i32 to index
    %c0_158 = arith.constant 0 : index
    %245 = vector.load %arg2[%244, %c0_158] : memref<32x128xf32, #tpu.memory_space<vmem>>, vector<1x128xf32>
    %246 = vector.shape_cast %245 : vector<1x128xf32> to vector<128xf32>
    %c3_159 = arith.constant 3 : index
    %c0_160 = arith.constant 0 : index
    %c0_161 = arith.constant 0 : index
    %247 = vector.load %arg4[%c3_159, %c0_160, %c0_161] : memref<8x8x128xf32, #tpu.memory_space<vmem>>, vector<1x1x128xf32>
    %248 = vector.shape_cast %247 : vector<1x1x128xf32> to vector<128xf32>
    %249 = vector.shape_cast %246 : vector<128xf32> to vector<1x1x128xf32>
    tpu.vector_store %arg4[%c3_159, %c0_160, %c0_161], %249 {strides = array<i32>} : memref<8x8x128xf32, #tpu.memory_space<vmem>>, vector<1x1x128xf32>,
    %c8_i32_162 = arith.constant 8 : i32
    %250 = arith.muli %arg0, %c8_i32_162 : i32
    %c3_i32_163 = arith.constant 3 : i32
    %251 = arith.addi %250, %c3_i32_163 : i32
    %252 = arith.index_cast %251 : i32 to index
    %c1_164 = arith.constant 1 : index
    %253 = memref.load %arg1[%252, %c1_164] : memref<16x8xi32, #tpu.memory_space<smem>>
    %254 = arith.index_cast %253 : i32 to index
    %c0_165 = arith.constant 0 : index
    %255 = vector.load %arg2[%254, %c0_165] : memref<32x128xf32, #tpu.memory_space<vmem>>, vector<1x128xf32>
    %256 = vector.shape_cast %255 : vector<1x128xf32> to vector<128xf32>
    %c3_166 = arith.constant 3 : index
    %c1_167 = arith.constant 1 : index
    %c0_168 = arith.constant 0 : index
    %257 = vector.load %arg4[%c3_166, %c1_167, %c0_168] : memref<8x8x128xf32, #tpu.memory_space<vmem>>, vector<1x1x128xf32>
    %258 = vector.shape_cast %257 : vector<1x1x128xf32> to vector<128xf32>
    %259 = vector.shape_cast %256 : vector<128xf32> to vector<1x1x128xf32>
    tpu.vector_store %arg4[%c3_166, %c1_167, %c0_168], %259 {strides = array<i32>} : memref<8x8x128xf32, #tpu.memory_space<vmem>>, vector<1x1x128xf32>,
    %c8_i32_169 = arith.constant 8 : i32
    %260 = arith.muli %arg0, %c8_i32_169 : i32
    %c3_i32_170 = arith.constant 3 : i32
    %261 = arith.addi %260, %c3_i32_170 : i32
    %262 = arith.index_cast %261 : i32 to index
    %c2_171 = arith.constant 2 : index
    %263 = memref.load %arg1[%262, %c2_171] : memref<16x8xi32, #tpu.memory_space<smem>>
    %264 = arith.index_cast %263 : i32 to index
    %c0_172 = arith.constant 0 : index
    %265 = vector.load %arg2[%264, %c0_172] : memref<32x128xf32, #tpu.memory_space<vmem>>, vector<1x128xf32>
    %266 = vector.shape_cast %265 : vector<1x128xf32> to vector<128xf32>
    %c3_173 = arith.constant 3 : index
    %c2_174 = arith.constant 2 : index
    %c0_175 = arith.constant 0 : index
    %267 = vector.load %arg4[%c3_173, %c2_174, %c0_175] : memref<8x8x128xf32, #tpu.memory_space<vmem>>, vector<1x1x128xf32>
    %268 = vector.shape_cast %267 : vector<1x1x128xf32> to vector<128xf32>
    %269 = vector.shape_cast %266 : vector<128xf32> to vector<1x1x128xf32>
    tpu.vector_store %arg4[%c3_173, %c2_174, %c0_175], %269 {strides = array<i32>} : memref<8x8x128xf32, #tpu.memory_space<vmem>>, vector<1x1x128xf32>,
    %c8_i32_176 = arith.constant 8 : i32
    %270 = arith.muli %arg0, %c8_i32_176 : i32
    %c3_i32_177 = arith.constant 3 : i32
    %271 = arith.addi %270, %c3_i32_177 : i32
    %272 = arith.index_cast %271 : i32 to index
    %c3_178 = arith.constant 3 : index
    %273 = memref.load %arg1[%272, %c3_178] : memref<16x8xi32, #tpu.memory_space<smem>>
    %274 = arith.index_cast %273 : i32 to index
    %c0_179 = arith.constant 0 : index
    %275 = vector.load %arg2[%274, %c0_179] : memref<32x128xf32, #tpu.memory_space<vmem>>, vector<1x128xf32>
    %276 = vector.shape_cast %275 : vector<1x128xf32> to vector<128xf32>
    %c3_180 = arith.constant 3 : index
    %c3_181 = arith.constant 3 : index
    %c0_182 = arith.constant 0 : index
    %277 = vector.load %arg4[%c3_180, %c3_181, %c0_182] : memref<8x8x128xf32, #tpu.memory_space<vmem>>, vector<1x1x128xf32>
    %278 = vector.shape_cast %277 : vector<1x1x128xf32> to vector<128xf32>
    %279 = vector.shape_cast %276 : vector<128xf32> to vector<1x1x128xf32>
    tpu.vector_store %arg4[%c3_180, %c3_181, %c0_182], %279 {strides = array<i32>} : memref<8x8x128xf32, #tpu.memory_space<vmem>>, vector<1x1x128xf32>,
    %c8_i32_183 = arith.constant 8 : i32
    %280 = arith.muli %arg0, %c8_i32_183 : i32
    %c3_i32_184 = arith.constant 3 : i32
    %281 = arith.addi %280, %c3_i32_184 : i32
    %282 = arith.index_cast %281 : i32 to index
    %c4_185 = arith.constant 4 : index
    %283 = memref.load %arg1[%282, %c4_185] : memref<16x8xi32, #tpu.memory_space<smem>>
    %284 = arith.index_cast %283 : i32 to index
    %c0_186 = arith.constant 0 : index
    %285 = vector.load %arg2[%284, %c0_186] : memref<32x128xf32, #tpu.memory_space<vmem>>, vector<1x128xf32>
    %286 = vector.shape_cast %285 : vector<1x128xf32> to vector<128xf32>
    %c3_187 = arith.constant 3 : index
    %c4_188 = arith.constant 4 : index
    %c0_189 = arith.constant 0 : index
    %287 = vector.load %arg4[%c3_187, %c4_188, %c0_189] : memref<8x8x128xf32, #tpu.memory_space<vmem>>, vector<1x1x128xf32>
    %288 = vector.shape_cast %287 : vector<1x1x128xf32> to vector<128xf32>
    %289 = vector.shape_cast %286 : vector<128xf32> to vector<1x1x128xf32>
    tpu.vector_store %arg4[%c3_187, %c4_188, %c0_189], %289 {strides = array<i32>} : memref<8x8x128xf32, #tpu.memory_space<vmem>>, vector<1x1x128xf32>,
    %c8_i32_190 = arith.constant 8 : i32
    %290 = arith.muli %arg0, %c8_i32_190 : i32
    %c3_i32_191 = arith.constant 3 : i32
    %291 = arith.addi %290, %c3_i32_191 : i32
    %292 = arith.index_cast %291 : i32 to index
    %c5_192 = arith.constant 5 : index
    %293 = memref.load %arg1[%292, %c5_192] : memref<16x8xi32, #tpu.memory_space<smem>>
    %294 = arith.index_cast %293 : i32 to index
    %c0_193 = arith.constant 0 : index
    %295 = vector.load %arg2[%294, %c0_193] : memref<32x128xf32, #tpu.memory_space<vmem>>, vector<1x128xf32>
    %296 = vector.shape_cast %295 : vector<1x128xf32> to vector<128xf32>
    %c3_194 = arith.constant 3 : index
    %c5_195 = arith.constant 5 : index
    %c0_196 = arith.constant 0 : index
    %297 = vector.load %arg4[%c3_194, %c5_195, %c0_196] : memref<8x8x128xf32, #tpu.memory_space<vmem>>, vector<1x1x128xf32>
    %298 = vector.shape_cast %297 : vector<1x1x128xf32> to vector<128xf32>
    %299 = vector.shape_cast %296 : vector<128xf32> to vector<1x1x128xf32>
    tpu.vector_store %arg4[%c3_194, %c5_195, %c0_196], %299 {strides = array<i32>} : memref<8x8x128xf32, #tpu.memory_space<vmem>>, vector<1x1x128xf32>,
    %c8_i32_197 = arith.constant 8 : i32
    %300 = arith.muli %arg0, %c8_i32_197 : i32
    %c3_i32_198 = arith.constant 3 : i32
    %301 = arith.addi %300, %c3_i32_198 : i32
    %302 = arith.index_cast %301 : i32 to index
    %c6_199 = arith.constant 6 : index
    %303 = memref.load %arg1[%302, %c6_199] : memref<16x8xi32, #tpu.memory_space<smem>>
    %304 = arith.index_cast %303 : i32 to index
    %c0_200 = arith.constant 0 : index
    %305 = vector.load %arg2[%304, %c0_200] : memref<32x128xf32, #tpu.memory_space<vmem>>, vector<1x128xf32>
    %306 = vector.shape_cast %305 : vector<1x128xf32> to vector<128xf32>
    %c3_201 = arith.constant 3 : index
    %c6_202 = arith.constant 6 : index
    %c0_203 = arith.constant 0 : index
    %307 = vector.load %arg4[%c3_201, %c6_202, %c0_203] : memref<8x8x128xf32, #tpu.memory_space<vmem>>, vector<1x1x128xf32>
    %308 = vector.shape_cast %307 : vector<1x1x128xf32> to vector<128xf32>
    %309 = vector.shape_cast %306 : vector<128xf32> to vector<1x1x128xf32>
    tpu.vector_store %arg4[%c3_201, %c6_202, %c0_203], %309 {strides = array<i32>} : memref<8x8x128xf32, #tpu.memory_space<vmem>>, vector<1x1x128xf32>,
    %c8_i32_204 = arith.constant 8 : i32
    %310 = arith.muli %arg0, %c8_i32_204 : i32
    %c3_i32_205 = arith.constant 3 : i32
    %311 = arith.addi %310, %c3_i32_205 : i32
    %312 = arith.index_cast %311 : i32 to index
    %c7_206 = arith.constant 7 : index
    %313 = memref.load %arg1[%312, %c7_206] : memref<16x8xi32, #tpu.memory_space<smem>>
    %314 = arith.index_cast %313 : i32 to index
    %c0_207 = arith.constant 0 : index
    %315 = vector.load %arg2[%314, %c0_207] : memref<32x128xf32, #tpu.memory_space<vmem>>, vector<1x128xf32>
    %316 = vector.shape_cast %315 : vector<1x128xf32> to vector<128xf32>
    %c3_208 = arith.constant 3 : index
    %c7_209 = arith.constant 7 : index
    %c0_210 = arith.constant 0 : index
    %317 = vector.load %arg4[%c3_208, %c7_209, %c0_210] : memref<8x8x128xf32, #tpu.memory_space<vmem>>, vector<1x1x128xf32>
    %318 = vector.shape_cast %317 : vector<1x1x128xf32> to vector<128xf32>
    %319 = vector.shape_cast %316 : vector<128xf32> to vector<1x1x128xf32>
    tpu.vector_store %arg4[%c3_208, %c7_209, %c0_210], %319 {strides = array<i32>} : memref<8x8x128xf32, #tpu.memory_space<vmem>>, vector<1x1x128xf32>,
    %c8_i32_211 = arith.constant 8 : i32
    %320 = arith.muli %arg0, %c8_i32_211 : i32
    %c4_i32 = arith.constant 4 : i32
    %321 = arith.addi %320, %c4_i32 : i32
    %322 = arith.index_cast %321 : i32 to index
    %c0_212 = arith.constant 0 : index
    %323 = memref.load %arg1[%322, %c0_212] : memref<16x8xi32, #tpu.memory_space<smem>>
    %324 = arith.index_cast %323 : i32 to index
    %c0_213 = arith.constant 0 : index
    %325 = vector.load %arg2[%324, %c0_213] : memref<32x128xf32, #tpu.memory_space<vmem>>, vector<1x128xf32>
    %326 = vector.shape_cast %325 : vector<1x128xf32> to vector<128xf32>
    %c4_214 = arith.constant 4 : index
    %c0_215 = arith.constant 0 : index
    %c0_216 = arith.constant 0 : index
    %327 = vector.load %arg4[%c4_214, %c0_215, %c0_216] : memref<8x8x128xf32, #tpu.memory_space<vmem>>, vector<1x1x128xf32>
    %328 = vector.shape_cast %327 : vector<1x1x128xf32> to vector<128xf32>
    %329 = vector.shape_cast %326 : vector<128xf32> to vector<1x1x128xf32>
    tpu.vector_store %arg4[%c4_214, %c0_215, %c0_216], %329 {strides = array<i32>} : memref<8x8x128xf32, #tpu.memory_space<vmem>>, vector<1x1x128xf32>,
    %c8_i32_217 = arith.constant 8 : i32
    %330 = arith.muli %arg0, %c8_i32_217 : i32
    %c4_i32_218 = arith.constant 4 : i32
    %331 = arith.addi %330, %c4_i32_218 : i32
    %332 = arith.index_cast %331 : i32 to index
    %c1_219 = arith.constant 1 : index
    %333 = memref.load %arg1[%332, %c1_219] : memref<16x8xi32, #tpu.memory_space<smem>>
    %334 = arith.index_cast %333 : i32 to index
    %c0_220 = arith.constant 0 : index
    %335 = vector.load %arg2[%334, %c0_220] : memref<32x128xf32, #tpu.memory_space<vmem>>, vector<1x128xf32>
    %336 = vector.shape_cast %335 : vector<1x128xf32> to vector<128xf32>
    %c4_221 = arith.constant 4 : index
    %c1_222 = arith.constant 1 : index
    %c0_223 = arith.constant 0 : index
    %337 = vector.load %arg4[%c4_221, %c1_222, %c0_223] : memref<8x8x128xf32, #tpu.memory_space<vmem>>, vector<1x1x128xf32>
    %338 = vector.shape_cast %337 : vector<1x1x128xf32> to vector<128xf32>
    %339 = vector.shape_cast %336 : vector<128xf32> to vector<1x1x128xf32>
    tpu.vector_store %arg4[%c4_221, %c1_222, %c0_223], %339 {strides = array<i32>} : memref<8x8x128xf32, #tpu.memory_space<vmem>>, vector<1x1x128xf32>,
    %c8_i32_224 = arith.constant 8 : i32
    %340 = arith.muli %arg0, %c8_i32_224 : i32
    %c4_i32_225 = arith.constant 4 : i32
    %341 = arith.addi %340, %c4_i32_225 : i32
    %342 = arith.index_cast %341 : i32 to index
    %c2_226 = arith.constant 2 : index
    %343 = memref.load %arg1[%342, %c2_226] : memref<16x8xi32, #tpu.memory_space<smem>>
    %344 = arith.index_cast %343 : i32 to index
    %c0_227 = arith.constant 0 : index
    %345 = vector.load %arg2[%344, %c0_227] : memref<32x128xf32, #tpu.memory_space<vmem>>, vector<1x128xf32>
    %346 = vector.shape_cast %345 : vector<1x128xf32> to vector<128xf32>
    %c4_228 = arith.constant 4 : index
    %c2_229 = arith.constant 2 : index
    %c0_230 = arith.constant 0 : index
    %347 = vector.load %arg4[%c4_228, %c2_229, %c0_230] : memref<8x8x128xf32, #tpu.memory_space<vmem>>, vector<1x1x128xf32>
    %348 = vector.shape_cast %347 : vector<1x1x128xf32> to vector<128xf32>
    %349 = vector.shape_cast %346 : vector<128xf32> to vector<1x1x128xf32>
    tpu.vector_store %arg4[%c4_228, %c2_229, %c0_230], %349 {strides = array<i32>} : memref<8x8x128xf32, #tpu.memory_space<vmem>>, vector<1x1x128xf32>,
    %c8_i32_231 = arith.constant 8 : i32
    %350 = arith.muli %arg0, %c8_i32_231 : i32
    %c4_i32_232 = arith.constant 4 : i32
    %351 = arith.addi %350, %c4_i32_232 : i32
    %352 = arith.index_cast %351 : i32 to index
    %c3_233 = arith.constant 3 : index
    %353 = memref.load %arg1[%352, %c3_233] : memref<16x8xi32, #tpu.memory_space<smem>>
    %354 = arith.index_cast %353 : i32 to index
    %c0_234 = arith.constant 0 : index
    %355 = vector.load %arg2[%354, %c0_234] : memref<32x128xf32, #tpu.memory_space<vmem>>, vector<1x128xf32>
    %356 = vector.shape_cast %355 : vector<1x128xf32> to vector<128xf32>
    %c4_235 = arith.constant 4 : index
    %c3_236 = arith.constant 3 : index
    %c0_237 = arith.constant 0 : index
    %357 = vector.load %arg4[%c4_235, %c3_236, %c0_237] : memref<8x8x128xf32, #tpu.memory_space<vmem>>, vector<1x1x128xf32>
    %358 = vector.shape_cast %357 : vector<1x1x128xf32> to vector<128xf32>
    %359 = vector.shape_cast %356 : vector<128xf32> to vector<1x1x128xf32>
    tpu.vector_store %arg4[%c4_235, %c3_236, %c0_237], %359 {strides = array<i32>} : memref<8x8x128xf32, #tpu.memory_space<vmem>>, vector<1x1x128xf32>,
    %c8_i32_238 = arith.constant 8 : i32
    %360 = arith.muli %arg0, %c8_i32_238 : i32
    %c4_i32_239 = arith.constant 4 : i32
    %361 = arith.addi %360, %c4_i32_239 : i32
    %362 = arith.index_cast %361 : i32 to index
    %c4_240 = arith.constant 4 : index
    %363 = memref.load %arg1[%362, %c4_240] : memref<16x8xi32, #tpu.memory_space<smem>>
    %364 = arith.index_cast %363 : i32 to index
    %c0_241 = arith.constant 0 : index
    %365 = vector.load %arg2[%364, %c0_241] : memref<32x128xf32, #tpu.memory_space<vmem>>, vector<1x128xf32>
    %366 = vector.shape_cast %365 : vector<1x128xf32> to vector<128xf32>
    %c4_242 = arith.constant 4 : index
    %c4_243 = arith.constant 4 : index
    %c0_244 = arith.constant 0 : index
    %367 = vector.load %arg4[%c4_242, %c4_243, %c0_244] : memref<8x8x128xf32, #tpu.memory_space<vmem>>, vector<1x1x128xf32>
    %368 = vector.shape_cast %367 : vector<1x1x128xf32> to vector<128xf32>
    %369 = vector.shape_cast %366 : vector<128xf32> to vector<1x1x128xf32>
    tpu.vector_store %arg4[%c4_242, %c4_243, %c0_244], %369 {strides = array<i32>} : memref<8x8x128xf32, #tpu.memory_space<vmem>>, vector<1x1x128xf32>,
    %c8_i32_245 = arith.constant 8 : i32
    %370 = arith.muli %arg0, %c8_i32_245 : i32
    %c4_i32_246 = arith.constant 4 : i32
    %371 = arith.addi %370, %c4_i32_246 : i32
    %372 = arith.index_cast %371 : i32 to index
    %c5_247 = arith.constant 5 : index
    %373 = memref.load %arg1[%372, %c5_247] : memref<16x8xi32, #tpu.memory_space<smem>>
    %374 = arith.index_cast %373 : i32 to index
    %c0_248 = arith.constant 0 : index
    %375 = vector.load %arg2[%374, %c0_248] : memref<32x128xf32, #tpu.memory_space<vmem>>, vector<1x128xf32>
    %376 = vector.shape_cast %375 : vector<1x128xf32> to vector<128xf32>
    %c4_249 = arith.constant 4 : index
    %c5_250 = arith.constant 5 : index
    %c0_251 = arith.constant 0 : index
    %377 = vector.load %arg4[%c4_249, %c5_250, %c0_251] : memref<8x8x128xf32, #tpu.memory_space<vmem>>, vector<1x1x128xf32>
    %378 = vector.shape_cast %377 : vector<1x1x128xf32> to vector<128xf32>
    %379 = vector.shape_cast %376 : vector<128xf32> to vector<1x1x128xf32>
    tpu.vector_store %arg4[%c4_249, %c5_250, %c0_251], %379 {strides = array<i32>} : memref<8x8x128xf32, #tpu.memory_space<vmem>>, vector<1x1x128xf32>,
    %c8_i32_252 = arith.constant 8 : i32
    %380 = arith.muli %arg0, %c8_i32_252 : i32
    %c4_i32_253 = arith.constant 4 : i32
    %381 = arith.addi %380, %c4_i32_253 : i32
    %382 = arith.index_cast %381 : i32 to index
    %c6_254 = arith.constant 6 : index
    %383 = memref.load %arg1[%382, %c6_254] : memref<16x8xi32, #tpu.memory_space<smem>>
    %384 = arith.index_cast %383 : i32 to index
    %c0_255 = arith.constant 0 : index
    %385 = vector.load %arg2[%384, %c0_255] : memref<32x128xf32, #tpu.memory_space<vmem>>, vector<1x128xf32>
    %386 = vector.shape_cast %385 : vector<1x128xf32> to vector<128xf32>
    %c4_256 = arith.constant 4 : index
    %c6_257 = arith.constant 6 : index
    %c0_258 = arith.constant 0 : index
    %387 = vector.load %arg4[%c4_256, %c6_257, %c0_258] : memref<8x8x128xf32, #tpu.memory_space<vmem>>, vector<1x1x128xf32>
    %388 = vector.shape_cast %387 : vector<1x1x128xf32> to vector<128xf32>
    %389 = vector.shape_cast %386 : vector<128xf32> to vector<1x1x128xf32>
    tpu.vector_store %arg4[%c4_256, %c6_257, %c0_258], %389 {strides = array<i32>} : memref<8x8x128xf32, #tpu.memory_space<vmem>>, vector<1x1x128xf32>,
    %c8_i32_259 = arith.constant 8 : i32
    %390 = arith.muli %arg0, %c8_i32_259 : i32
    %c4_i32_260 = arith.constant 4 : i32
    %391 = arith.addi %390, %c4_i32_260 : i32
    %392 = arith.index_cast %391 : i32 to index
    %c7_261 = arith.constant 7 : index
    %393 = memref.load %arg1[%392, %c7_261] : memref<16x8xi32, #tpu.memory_space<smem>>
    %394 = arith.index_cast %393 : i32 to index
    %c0_262 = arith.constant 0 : index
    %395 = vector.load %arg2[%394, %c0_262] : memref<32x128xf32, #tpu.memory_space<vmem>>, vector<1x128xf32>
    %396 = vector.shape_cast %395 : vector<1x128xf32> to vector<128xf32>
    %c4_263 = arith.constant 4 : index
    %c7_264 = arith.constant 7 : index
    %c0_265 = arith.constant 0 : index
    %397 = vector.load %arg4[%c4_263, %c7_264, %c0_265] : memref<8x8x128xf32, #tpu.memory_space<vmem>>, vector<1x1x128xf32>
    %398 = vector.shape_cast %397 : vector<1x1x128xf32> to vector<128xf32>
    %399 = vector.shape_cast %396 : vector<128xf32> to vector<1x1x128xf32>
    tpu.vector_store %arg4[%c4_263, %c7_264, %c0_265], %399 {strides = array<i32>} : memref<8x8x128xf32, #tpu.memory_space<vmem>>, vector<1x1x128xf32>,
    %c8_i32_266 = arith.constant 8 : i32
    %400 = arith.muli %arg0, %c8_i32_266 : i32
    %c5_i32 = arith.constant 5 : i32
    %401 = arith.addi %400, %c5_i32 : i32
    %402 = arith.index_cast %401 : i32 to index
    %c0_267 = arith.constant 0 : index
    %403 = memref.load %arg1[%402, %c0_267] : memref<16x8xi32, #tpu.memory_space<smem>>
    %404 = arith.index_cast %403 : i32 to index
    %c0_268 = arith.constant 0 : index
    %405 = vector.load %arg2[%404, %c0_268] : memref<32x128xf32, #tpu.memory_space<vmem>>, vector<1x128xf32>
    %406 = vector.shape_cast %405 : vector<1x128xf32> to vector<128xf32>
    %c5_269 = arith.constant 5 : index
    %c0_270 = arith.constant 0 : index
    %c0_271 = arith.constant 0 : index
    %407 = vector.load %arg4[%c5_269, %c0_270, %c0_271] : memref<8x8x128xf32, #tpu.memory_space<vmem>>, vector<1x1x128xf32>
    %408 = vector.shape_cast %407 : vector<1x1x128xf32> to vector<128xf32>
    %409 = vector.shape_cast %406 : vector<128xf32> to vector<1x1x128xf32>
    tpu.vector_store %arg4[%c5_269, %c0_270, %c0_271], %409 {strides = array<i32>} : memref<8x8x128xf32, #tpu.memory_space<vmem>>, vector<1x1x128xf32>,
    %c8_i32_272 = arith.constant 8 : i32
    %410 = arith.muli %arg0, %c8_i32_272 : i32
    %c5_i32_273 = arith.constant 5 : i32
    %411 = arith.addi %410, %c5_i32_273 : i32
    %412 = arith.index_cast %411 : i32 to index
    %c1_274 = arith.constant 1 : index
    %413 = memref.load %arg1[%412, %c1_274] : memref<16x8xi32, #tpu.memory_space<smem>>
    %414 = arith.index_cast %413 : i32 to index
    %c0_275 = arith.constant 0 : index
    %415 = vector.load %arg2[%414, %c0_275] : memref<32x128xf32, #tpu.memory_space<vmem>>, vector<1x128xf32>
    %416 = vector.shape_cast %415 : vector<1x128xf32> to vector<128xf32>
    %c5_276 = arith.constant 5 : index
    %c1_277 = arith.constant 1 : index
    %c0_278 = arith.constant 0 : index
    %417 = vector.load %arg4[%c5_276, %c1_277, %c0_278] : memref<8x8x128xf32, #tpu.memory_space<vmem>>, vector<1x1x128xf32>
    %418 = vector.shape_cast %417 : vector<1x1x128xf32> to vector<128xf32>
    %419 = vector.shape_cast %416 : vector<128xf32> to vector<1x1x128xf32>
    tpu.vector_store %arg4[%c5_276, %c1_277, %c0_278], %419 {strides = array<i32>} : memref<8x8x128xf32, #tpu.memory_space<vmem>>, vector<1x1x128xf32>,
    %c8_i32_279 = arith.constant 8 : i32
    %420 = arith.muli %arg0, %c8_i32_279 : i32
    %c5_i32_280 = arith.constant 5 : i32
    %421 = arith.addi %420, %c5_i32_280 : i32
    %422 = arith.index_cast %421 : i32 to index
    %c2_281 = arith.constant 2 : index
    %423 = memref.load %arg1[%422, %c2_281] : memref<16x8xi32, #tpu.memory_space<smem>>
    %424 = arith.index_cast %423 : i32 to index
    %c0_282 = arith.constant 0 : index
    %425 = vector.load %arg2[%424, %c0_282] : memref<32x128xf32, #tpu.memory_space<vmem>>, vector<1x128xf32>
    %426 = vector.shape_cast %425 : vector<1x128xf32> to vector<128xf32>
    %c5_283 = arith.constant 5 : index
    %c2_284 = arith.constant 2 : index
    %c0_285 = arith.constant 0 : index
    %427 = vector.load %arg4[%c5_283, %c2_284, %c0_285] : memref<8x8x128xf32, #tpu.memory_space<vmem>>, vector<1x1x128xf32>
    %428 = vector.shape_cast %427 : vector<1x1x128xf32> to vector<128xf32>
    %429 = vector.shape_cast %426 : vector<128xf32> to vector<1x1x128xf32>
    tpu.vector_store %arg4[%c5_283, %c2_284, %c0_285], %429 {strides = array<i32>} : memref<8x8x128xf32, #tpu.memory_space<vmem>>, vector<1x1x128xf32>,
    %c8_i32_286 = arith.constant 8 : i32
    %430 = arith.muli %arg0, %c8_i32_286 : i32
    %c5_i32_287 = arith.constant 5 : i32
    %431 = arith.addi %430, %c5_i32_287 : i32
    %432 = arith.index_cast %431 : i32 to index
    %c3_288 = arith.constant 3 : index
    %433 = memref.load %arg1[%432, %c3_288] : memref<16x8xi32, #tpu.memory_space<smem>>
    %434 = arith.index_cast %433 : i32 to index
    %c0_289 = arith.constant 0 : index
    %435 = vector.load %arg2[%434, %c0_289] : memref<32x128xf32, #tpu.memory_space<vmem>>, vector<1x128xf32>
    %436 = vector.shape_cast %435 : vector<1x128xf32> to vector<128xf32>
    %c5_290 = arith.constant 5 : index
    %c3_291 = arith.constant 3 : index
    %c0_292 = arith.constant 0 : index
    %437 = vector.load %arg4[%c5_290, %c3_291, %c0_292] : memref<8x8x128xf32, #tpu.memory_space<vmem>>, vector<1x1x128xf32>
    %438 = vector.shape_cast %437 : vector<1x1x128xf32> to vector<128xf32>
    %439 = vector.shape_cast %436 : vector<128xf32> to vector<1x1x128xf32>
    tpu.vector_store %arg4[%c5_290, %c3_291, %c0_292], %439 {strides = array<i32>} : memref<8x8x128xf32, #tpu.memory_space<vmem>>, vector<1x1x128xf32>,
    %c8_i32_293 = arith.constant 8 : i32
    %440 = arith.muli %arg0, %c8_i32_293 : i32
    %c5_i32_294 = arith.constant 5 : i32
    %441 = arith.addi %440, %c5_i32_294 : i32
    %442 = arith.index_cast %441 : i32 to index
    %c4_295 = arith.constant 4 : index
    %443 = memref.load %arg1[%442, %c4_295] : memref<16x8xi32, #tpu.memory_space<smem>>
    %444 = arith.index_cast %443 : i32 to index
    %c0_296 = arith.constant 0 : index
    %445 = vector.load %arg2[%444, %c0_296] : memref<32x128xf32, #tpu.memory_space<vmem>>, vector<1x128xf32>
    %446 = vector.shape_cast %445 : vector<1x128xf32> to vector<128xf32>
    %c5_297 = arith.constant 5 : index
    %c4_298 = arith.constant 4 : index
    %c0_299 = arith.constant 0 : index
    %447 = vector.load %arg4[%c5_297, %c4_298, %c0_299] : memref<8x8x128xf32, #tpu.memory_space<vmem>>, vector<1x1x128xf32>
    %448 = vector.shape_cast %447 : vector<1x1x128xf32> to vector<128xf32>
    %449 = vector.shape_cast %446 : vector<128xf32> to vector<1x1x128xf32>
    tpu.vector_store %arg4[%c5_297, %c4_298, %c0_299], %449 {strides = array<i32>} : memref<8x8x128xf32, #tpu.memory_space<vmem>>, vector<1x1x128xf32>,
    %c8_i32_300 = arith.constant 8 : i32
    %450 = arith.muli %arg0, %c8_i32_300 : i32
    %c5_i32_301 = arith.constant 5 : i32
    %451 = arith.addi %450, %c5_i32_301 : i32
    %452 = arith.index_cast %451 : i32 to index
    %c5_302 = arith.constant 5 : index
    %453 = memref.load %arg1[%452, %c5_302] : memref<16x8xi32, #tpu.memory_space<smem>>
    %454 = arith.index_cast %453 : i32 to index
    %c0_303 = arith.constant 0 : index
    %455 = vector.load %arg2[%454, %c0_303] : memref<32x128xf32, #tpu.memory_space<vmem>>, vector<1x128xf32>
    %456 = vector.shape_cast %455 : vector<1x128xf32> to vector<128xf32>
    %c5_304 = arith.constant 5 : index
    %c5_305 = arith.constant 5 : index
    %c0_306 = arith.constant 0 : index
    %457 = vector.load %arg4[%c5_304, %c5_305, %c0_306] : memref<8x8x128xf32, #tpu.memory_space<vmem>>, vector<1x1x128xf32>
    %458 = vector.shape_cast %457 : vector<1x1x128xf32> to vector<128xf32>
    %459 = vector.shape_cast %456 : vector<128xf32> to vector<1x1x128xf32>
    tpu.vector_store %arg4[%c5_304, %c5_305, %c0_306], %459 {strides = array<i32>} : memref<8x8x128xf32, #tpu.memory_space<vmem>>, vector<1x1x128xf32>,
    %c8_i32_307 = arith.constant 8 : i32
    %460 = arith.muli %arg0, %c8_i32_307 : i32
    %c5_i32_308 = arith.constant 5 : i32
    %461 = arith.addi %460, %c5_i32_308 : i32
    %462 = arith.index_cast %461 : i32 to index
    %c6_309 = arith.constant 6 : index
    %463 = memref.load %arg1[%462, %c6_309] : memref<16x8xi32, #tpu.memory_space<smem>>
    %464 = arith.index_cast %463 : i32 to index
    %c0_310 = arith.constant 0 : index
    %465 = vector.load %arg2[%464, %c0_310] : memref<32x128xf32, #tpu.memory_space<vmem>>, vector<1x128xf32>
    %466 = vector.shape_cast %465 : vector<1x128xf32> to vector<128xf32>
    %c5_311 = arith.constant 5 : index
    %c6_312 = arith.constant 6 : index
    %c0_313 = arith.constant 0 : index
    %467 = vector.load %arg4[%c5_311, %c6_312, %c0_313] : memref<8x8x128xf32, #tpu.memory_space<vmem>>, vector<1x1x128xf32>
    %468 = vector.shape_cast %467 : vector<1x1x128xf32> to vector<128xf32>
    %469 = vector.shape_cast %466 : vector<128xf32> to vector<1x1x128xf32>
    tpu.vector_store %arg4[%c5_311, %c6_312, %c0_313], %469 {strides = array<i32>} : memref<8x8x128xf32, #tpu.memory_space<vmem>>, vector<1x1x128xf32>,
    %c8_i32_314 = arith.constant 8 : i32
    %470 = arith.muli %arg0, %c8_i32_314 : i32
    %c5_i32_315 = arith.constant 5 : i32
    %471 = arith.addi %470, %c5_i32_315 : i32
    %472 = arith.index_cast %471 : i32 to index
    %c7_316 = arith.constant 7 : index
    %473 = memref.load %arg1[%472, %c7_316] : memref<16x8xi32, #tpu.memory_space<smem>>
    %474 = arith.index_cast %473 : i32 to index
    %c0_317 = arith.constant 0 : index
    %475 = vector.load %arg2[%474, %c0_317] : memref<32x128xf32, #tpu.memory_space<vmem>>, vector<1x128xf32>
    %476 = vector.shape_cast %475 : vector<1x128xf32> to vector<128xf32>
    %c5_318 = arith.constant 5 : index
    %c7_319 = arith.constant 7 : index
    %c0_320 = arith.constant 0 : index
    %477 = vector.load %arg4[%c5_318, %c7_319, %c0_320] : memref<8x8x128xf32, #tpu.memory_space<vmem>>, vector<1x1x128xf32>
    %478 = vector.shape_cast %477 : vector<1x1x128xf32> to vector<128xf32>
    %479 = vector.shape_cast %476 : vector<128xf32> to vector<1x1x128xf32>
    tpu.vector_store %arg4[%c5_318, %c7_319, %c0_320], %479 {strides = array<i32>} : memref<8x8x128xf32, #tpu.memory_space<vmem>>, vector<1x1x128xf32>,
    %c8_i32_321 = arith.constant 8 : i32
    %480 = arith.muli %arg0, %c8_i32_321 : i32
    %c6_i32 = arith.constant 6 : i32
    %481 = arith.addi %480, %c6_i32 : i32
    %482 = arith.index_cast %481 : i32 to index
    %c0_322 = arith.constant 0 : index
    %483 = memref.load %arg1[%482, %c0_322] : memref<16x8xi32, #tpu.memory_space<smem>>
    %484 = arith.index_cast %483 : i32 to index
    %c0_323 = arith.constant 0 : index
    %485 = vector.load %arg2[%484, %c0_323] : memref<32x128xf32, #tpu.memory_space<vmem>>, vector<1x128xf32>
    %486 = vector.shape_cast %485 : vector<1x128xf32> to vector<128xf32>
    %c6_324 = arith.constant 6 : index
    %c0_325 = arith.constant 0 : index
    %c0_326 = arith.constant 0 : index
    %487 = vector.load %arg4[%c6_324, %c0_325, %c0_326] : memref<8x8x128xf32, #tpu.memory_space<vmem>>, vector<1x1x128xf32>
    %488 = vector.shape_cast %487 : vector<1x1x128xf32> to vector<128xf32>
    %489 = vector.shape_cast %486 : vector<128xf32> to vector<1x1x128xf32>
    tpu.vector_store %arg4[%c6_324, %c0_325, %c0_326], %489 {strides = array<i32>} : memref<8x8x128xf32, #tpu.memory_space<vmem>>, vector<1x1x128xf32>,
    %c8_i32_327 = arith.constant 8 : i32
    %490 = arith.muli %arg0, %c8_i32_327 : i32
    %c6_i32_328 = arith.constant 6 : i32
    %491 = arith.addi %490, %c6_i32_328 : i32
    %492 = arith.index_cast %491 : i32 to index
    %c1_329 = arith.constant 1 : index
    %493 = memref.load %arg1[%492, %c1_329] : memref<16x8xi32, #tpu.memory_space<smem>>
    %494 = arith.index_cast %493 : i32 to index
    %c0_330 = arith.constant 0 : index
    %495 = vector.load %arg2[%494, %c0_330] : memref<32x128xf32, #tpu.memory_space<vmem>>, vector<1x128xf32>
    %496 = vector.shape_cast %495 : vector<1x128xf32> to vector<128xf32>
    %c6_331 = arith.constant 6 : index
    %c1_332 = arith.constant 1 : index
    %c0_333 = arith.constant 0 : index
    %497 = vector.load %arg4[%c6_331, %c1_332, %c0_333] : memref<8x8x128xf32, #tpu.memory_space<vmem>>, vector<1x1x128xf32>
    %498 = vector.shape_cast %497 : vector<1x1x128xf32> to vector<128xf32>
    %499 = vector.shape_cast %496 : vector<128xf32> to vector<1x1x128xf32>
    tpu.vector_store %arg4[%c6_331, %c1_332, %c0_333], %499 {strides = array<i32>} : memref<8x8x128xf32, #tpu.memory_space<vmem>>, vector<1x1x128xf32>,
    %c8_i32_334 = arith.constant 8 : i32
    %500 = arith.muli %arg0, %c8_i32_334 : i32
    %c6_i32_335 = arith.constant 6 : i32
    %501 = arith.addi %500, %c6_i32_335 : i32
    %502 = arith.index_cast %501 : i32 to index
    %c2_336 = arith.constant 2 : index
    %503 = memref.load %arg1[%502, %c2_336] : memref<16x8xi32, #tpu.memory_space<smem>>
    %504 = arith.index_cast %503 : i32 to index
    %c0_337 = arith.constant 0 : index
    %505 = vector.load %arg2[%504, %c0_337] : memref<32x128xf32, #tpu.memory_space<vmem>>, vector<1x128xf32>
    %506 = vector.shape_cast %505 : vector<1x128xf32> to vector<128xf32>
    %c6_338 = arith.constant 6 : index
    %c2_339 = arith.constant 2 : index
    %c0_340 = arith.constant 0 : index
    %507 = vector.load %arg4[%c6_338, %c2_339, %c0_340] : memref<8x8x128xf32, #tpu.memory_space<vmem>>, vector<1x1x128xf32>
    %508 = vector.shape_cast %507 : vector<1x1x128xf32> to vector<128xf32>
    %509 = vector.shape_cast %506 : vector<128xf32> to vector<1x1x128xf32>
    tpu.vector_store %arg4[%c6_338, %c2_339, %c0_340], %509 {strides = array<i32>} : memref<8x8x128xf32, #tpu.memory_space<vmem>>, vector<1x1x128xf32>,
    %c8_i32_341 = arith.constant 8 : i32
    %510 = arith.muli %arg0, %c8_i32_341 : i32
    %c6_i32_342 = arith.constant 6 : i32
    %511 = arith.addi %510, %c6_i32_342 : i32
    %512 = arith.index_cast %511 : i32 to index
    %c3_343 = arith.constant 3 : index
    %513 = memref.load %arg1[%512, %c3_343] : memref<16x8xi32, #tpu.memory_space<smem>>
    %514 = arith.index_cast %513 : i32 to index
    %c0_344 = arith.constant 0 : index
    %515 = vector.load %arg2[%514, %c0_344] : memref<32x128xf32, #tpu.memory_space<vmem>>, vector<1x128xf32>
    %516 = vector.shape_cast %515 : vector<1x128xf32> to vector<128xf32>
    %c6_345 = arith.constant 6 : index
    %c3_346 = arith.constant 3 : index
    %c0_347 = arith.constant 0 : index
    %517 = vector.load %arg4[%c6_345, %c3_346, %c0_347] : memref<8x8x128xf32, #tpu.memory_space<vmem>>, vector<1x1x128xf32>
    %518 = vector.shape_cast %517 : vector<1x1x128xf32> to vector<128xf32>
    %519 = vector.shape_cast %516 : vector<128xf32> to vector<1x1x128xf32>
    tpu.vector_store %arg4[%c6_345, %c3_346, %c0_347], %519 {strides = array<i32>} : memref<8x8x128xf32, #tpu.memory_space<vmem>>, vector<1x1x128xf32>,
    %c8_i32_348 = arith.constant 8 : i32
    %520 = arith.muli %arg0, %c8_i32_348 : i32
    %c6_i32_349 = arith.constant 6 : i32
    %521 = arith.addi %520, %c6_i32_349 : i32
    %522 = arith.index_cast %521 : i32 to index
    %c4_350 = arith.constant 4 : index
    %523 = memref.load %arg1[%522, %c4_350] : memref<16x8xi32, #tpu.memory_space<smem>>
    %524 = arith.index_cast %523 : i32 to index
    %c0_351 = arith.constant 0 : index
    %525 = vector.load %arg2[%524, %c0_351] : memref<32x128xf32, #tpu.memory_space<vmem>>, vector<1x128xf32>
    %526 = vector.shape_cast %525 : vector<1x128xf32> to vector<128xf32>
    %c6_352 = arith.constant 6 : index
    %c4_353 = arith.constant 4 : index
    %c0_354 = arith.constant 0 : index
    %527 = vector.load %arg4[%c6_352, %c4_353, %c0_354] : memref<8x8x128xf32, #tpu.memory_space<vmem>>, vector<1x1x128xf32>
    %528 = vector.shape_cast %527 : vector<1x1x128xf32> to vector<128xf32>
    %529 = vector.shape_cast %526 : vector<128xf32> to vector<1x1x128xf32>
    tpu.vector_store %arg4[%c6_352, %c4_353, %c0_354], %529 {strides = array<i32>} : memref<8x8x128xf32, #tpu.memory_space<vmem>>, vector<1x1x128xf32>,
    %c8_i32_355 = arith.constant 8 : i32
    %530 = arith.muli %arg0, %c8_i32_355 : i32
    %c6_i32_356 = arith.constant 6 : i32
    %531 = arith.addi %530, %c6_i32_356 : i32
    %532 = arith.index_cast %531 : i32 to index
    %c5_357 = arith.constant 5 : index
    %533 = memref.load %arg1[%532, %c5_357] : memref<16x8xi32, #tpu.memory_space<smem>>
    %534 = arith.index_cast %533 : i32 to index
    %c0_358 = arith.constant 0 : index
    %535 = vector.load %arg2[%534, %c0_358] : memref<32x128xf32, #tpu.memory_space<vmem>>, vector<1x128xf32>
    %536 = vector.shape_cast %535 : vector<1x128xf32> to vector<128xf32>
    %c6_359 = arith.constant 6 : index
    %c5_360 = arith.constant 5 : index
    %c0_361 = arith.constant 0 : index
    %537 = vector.load %arg4[%c6_359, %c5_360, %c0_361] : memref<8x8x128xf32, #tpu.memory_space<vmem>>, vector<1x1x128xf32>
    %538 = vector.shape_cast %537 : vector<1x1x128xf32> to vector<128xf32>
    %539 = vector.shape_cast %536 : vector<128xf32> to vector<1x1x128xf32>
    tpu.vector_store %arg4[%c6_359, %c5_360, %c0_361], %539 {strides = array<i32>} : memref<8x8x128xf32, #tpu.memory_space<vmem>>, vector<1x1x128xf32>,
    %c8_i32_362 = arith.constant 8 : i32
    %540 = arith.muli %arg0, %c8_i32_362 : i32
    %c6_i32_363 = arith.constant 6 : i32
    %541 = arith.addi %540, %c6_i32_363 : i32
    %542 = arith.index_cast %541 : i32 to index
    %c6_364 = arith.constant 6 : index
    %543 = memref.load %arg1[%542, %c6_364] : memref<16x8xi32, #tpu.memory_space<smem>>
    %544 = arith.index_cast %543 : i32 to index
    %c0_365 = arith.constant 0 : index
    %545 = vector.load %arg2[%544, %c0_365] : memref<32x128xf32, #tpu.memory_space<vmem>>, vector<1x128xf32>
    %546 = vector.shape_cast %545 : vector<1x128xf32> to vector<128xf32>
    %c6_366 = arith.constant 6 : index
    %c6_367 = arith.constant 6 : index
    %c0_368 = arith.constant 0 : index
    %547 = vector.load %arg4[%c6_366, %c6_367, %c0_368] : memref<8x8x128xf32, #tpu.memory_space<vmem>>, vector<1x1x128xf32>
    %548 = vector.shape_cast %547 : vector<1x1x128xf32> to vector<128xf32>
    %549 = vector.shape_cast %546 : vector<128xf32> to vector<1x1x128xf32>
    tpu.vector_store %arg4[%c6_366, %c6_367, %c0_368], %549 {strides = array<i32>} : memref<8x8x128xf32, #tpu.memory_space<vmem>>, vector<1x1x128xf32>,
    %c8_i32_369 = arith.constant 8 : i32
    %550 = arith.muli %arg0, %c8_i32_369 : i32
    %c6_i32_370 = arith.constant 6 : i32
    %551 = arith.addi %550, %c6_i32_370 : i32
    %552 = arith.index_cast %551 : i32 to index
    %c7_371 = arith.constant 7 : index
    %553 = memref.load %arg1[%552, %c7_371] : memref<16x8xi32, #tpu.memory_space<smem>>
    %554 = arith.index_cast %553 : i32 to index
    %c0_372 = arith.constant 0 : index
    %555 = vector.load %arg2[%554, %c0_372] : memref<32x128xf32, #tpu.memory_space<vmem>>, vector<1x128xf32>
    %556 = vector.shape_cast %555 : vector<1x128xf32> to vector<128xf32>
    %c6_373 = arith.constant 6 : index
    %c7_374 = arith.constant 7 : index
    %c0_375 = arith.constant 0 : index
    %557 = vector.load %arg4[%c6_373, %c7_374, %c0_375] : memref<8x8x128xf32, #tpu.memory_space<vmem>>, vector<1x1x128xf32>
    %558 = vector.shape_cast %557 : vector<1x1x128xf32> to vector<128xf32>
    %559 = vector.shape_cast %556 : vector<128xf32> to vector<1x1x128xf32>
    tpu.vector_store %arg4[%c6_373, %c7_374, %c0_375], %559 {strides = array<i32>} : memref<8x8x128xf32, #tpu.memory_space<vmem>>, vector<1x1x128xf32>,
    %c8_i32_376 = arith.constant 8 : i32
    %560 = arith.muli %arg0, %c8_i32_376 : i32
    %c7_i32 = arith.constant 7 : i32
    %561 = arith.addi %560, %c7_i32 : i32
    %562 = arith.index_cast %561 : i32 to index
    %c0_377 = arith.constant 0 : index
    %563 = memref.load %arg1[%562, %c0_377] : memref<16x8xi32, #tpu.memory_space<smem>>
    %564 = arith.index_cast %563 : i32 to index
    %c0_378 = arith.constant 0 : index
    %565 = vector.load %arg2[%564, %c0_378] : memref<32x128xf32, #tpu.memory_space<vmem>>, vector<1x128xf32>
    %566 = vector.shape_cast %565 : vector<1x128xf32> to vector<128xf32>
    %c7_379 = arith.constant 7 : index
    %c0_380 = arith.constant 0 : index
    %c0_381 = arith.constant 0 : index
    %567 = vector.load %arg4[%c7_379, %c0_380, %c0_381] : memref<8x8x128xf32, #tpu.memory_space<vmem>>, vector<1x1x128xf32>
    %568 = vector.shape_cast %567 : vector<1x1x128xf32> to vector<128xf32>
    %569 = vector.shape_cast %566 : vector<128xf32> to vector<1x1x128xf32>
    tpu.vector_store %arg4[%c7_379, %c0_380, %c0_381], %569 {strides = array<i32>} : memref<8x8x128xf32, #tpu.memory_space<vmem>>, vector<1x1x128xf32>,
    %c8_i32_382 = arith.constant 8 : i32
    %570 = arith.muli %arg0, %c8_i32_382 : i32
    %c7_i32_383 = arith.constant 7 : i32
    %571 = arith.addi %570, %c7_i32_383 : i32
    %572 = arith.index_cast %571 : i32 to index
    %c1_384 = arith.constant 1 : index
    %573 = memref.load %arg1[%572, %c1_384] : memref<16x8xi32, #tpu.memory_space<smem>>
    %574 = arith.index_cast %573 : i32 to index
    %c0_385 = arith.constant 0 : index
    %575 = vector.load %arg2[%574, %c0_385] : memref<32x128xf32, #tpu.memory_space<vmem>>, vector<1x128xf32>
    %576 = vector.shape_cast %575 : vector<1x128xf32> to vector<128xf32>
    %c7_386 = arith.constant 7 : index
    %c1_387 = arith.constant 1 : index
    %c0_388 = arith.constant 0 : index
    %577 = vector.load %arg4[%c7_386, %c1_387, %c0_388] : memref<8x8x128xf32, #tpu.memory_space<vmem>>, vector<1x1x128xf32>
    %578 = vector.shape_cast %577 : vector<1x1x128xf32> to vector<128xf32>
    %579 = vector.shape_cast %576 : vector<128xf32> to vector<1x1x128xf32>
    tpu.vector_store %arg4[%c7_386, %c1_387, %c0_388], %579 {strides = array<i32>} : memref<8x8x128xf32, #tpu.memory_space<vmem>>, vector<1x1x128xf32>,
    %c8_i32_389 = arith.constant 8 : i32
    %580 = arith.muli %arg0, %c8_i32_389 : i32
    %c7_i32_390 = arith.constant 7 : i32
    %581 = arith.addi %580, %c7_i32_390 : i32
    %582 = arith.index_cast %581 : i32 to index
    %c2_391 = arith.constant 2 : index
    %583 = memref.load %arg1[%582, %c2_391] : memref<16x8xi32, #tpu.memory_space<smem>>
    %584 = arith.index_cast %583 : i32 to index
    %c0_392 = arith.constant 0 : index
    %585 = vector.load %arg2[%584, %c0_392] : memref<32x128xf32, #tpu.memory_space<vmem>>, vector<1x128xf32>
    %586 = vector.shape_cast %585 : vector<1x128xf32> to vector<128xf32>
    %c7_393 = arith.constant 7 : index
    %c2_394 = arith.constant 2 : index
    %c0_395 = arith.constant 0 : index
    %587 = vector.load %arg4[%c7_393, %c2_394, %c0_395] : memref<8x8x128xf32, #tpu.memory_space<vmem>>, vector<1x1x128xf32>
    %588 = vector.shape_cast %587 : vector<1x1x128xf32> to vector<128xf32>
    %589 = vector.shape_cast %586 : vector<128xf32> to vector<1x1x128xf32>
    tpu.vector_store %arg4[%c7_393, %c2_394, %c0_395], %589 {strides = array<i32>} : memref<8x8x128xf32, #tpu.memory_space<vmem>>, vector<1x1x128xf32>,
    %c8_i32_396 = arith.constant 8 : i32
    %590 = arith.muli %arg0, %c8_i32_396 : i32
    %c7_i32_397 = arith.constant 7 : i32
    %591 = arith.addi %590, %c7_i32_397 : i32
    %592 = arith.index_cast %591 : i32 to index
    %c3_398 = arith.constant 3 : index
    %593 = memref.load %arg1[%592, %c3_398] : memref<16x8xi32, #tpu.memory_space<smem>>
    %594 = arith.index_cast %593 : i32 to index
    %c0_399 = arith.constant 0 : index
    %595 = vector.load %arg2[%594, %c0_399] : memref<32x128xf32, #tpu.memory_space<vmem>>, vector<1x128xf32>
    %596 = vector.shape_cast %595 : vector<1x128xf32> to vector<128xf32>
    %c7_400 = arith.constant 7 : index
    %c3_401 = arith.constant 3 : index
    %c0_402 = arith.constant 0 : index
    %597 = vector.load %arg4[%c7_400, %c3_401, %c0_402] : memref<8x8x128xf32, #tpu.memory_space<vmem>>, vector<1x1x128xf32>
    %598 = vector.shape_cast %597 : vector<1x1x128xf32> to vector<128xf32>
    %599 = vector.shape_cast %596 : vector<128xf32> to vector<1x1x128xf32>
    tpu.vector_store %arg4[%c7_400, %c3_401, %c0_402], %599 {strides = array<i32>} : memref<8x8x128xf32, #tpu.memory_space<vmem>>, vector<1x1x128xf32>,
    %c8_i32_403 = arith.constant 8 : i32
    %600 = arith.muli %arg0, %c8_i32_403 : i32
    %c7_i32_404 = arith.constant 7 : i32
    %601 = arith.addi %600, %c7_i32_404 : i32
    %602 = arith.index_cast %601 : i32 to index
    %c4_405 = arith.constant 4 : index
    %603 = memref.load %arg1[%602, %c4_405] : memref<16x8xi32, #tpu.memory_space<smem>>
    %604 = arith.index_cast %603 : i32 to index
    %c0_406 = arith.constant 0 : index
    %605 = vector.load %arg2[%604, %c0_406] : memref<32x128xf32, #tpu.memory_space<vmem>>, vector<1x128xf32>
    %606 = vector.shape_cast %605 : vector<1x128xf32> to vector<128xf32>
    %c7_407 = arith.constant 7 : index
    %c4_408 = arith.constant 4 : index
    %c0_409 = arith.constant 0 : index
    %607 = vector.load %arg4[%c7_407, %c4_408, %c0_409] : memref<8x8x128xf32, #tpu.memory_space<vmem>>, vector<1x1x128xf32>
    %608 = vector.shape_cast %607 : vector<1x1x128xf32> to vector<128xf32>
    %609 = vector.shape_cast %606 : vector<128xf32> to vector<1x1x128xf32>
    tpu.vector_store %arg4[%c7_407, %c4_408, %c0_409], %609 {strides = array<i32>} : memref<8x8x128xf32, #tpu.memory_space<vmem>>, vector<1x1x128xf32>,
    %c8_i32_410 = arith.constant 8 : i32
    %610 = arith.muli %arg0, %c8_i32_410 : i32
    %c7_i32_411 = arith.constant 7 : i32
    %611 = arith.addi %610, %c7_i32_411 : i32
    %612 = arith.index_cast %611 : i32 to index
    %c5_412 = arith.constant 5 : index
    %613 = memref.load %arg1[%612, %c5_412] : memref<16x8xi32, #tpu.memory_space<smem>>
    %614 = arith.index_cast %613 : i32 to index
    %c0_413 = arith.constant 0 : index
    %615 = vector.load %arg2[%614, %c0_413] : memref<32x128xf32, #tpu.memory_space<vmem>>, vector<1x128xf32>
    %616 = vector.shape_cast %615 : vector<1x128xf32> to vector<128xf32>
    %c7_414 = arith.constant 7 : index
    %c5_415 = arith.constant 5 : index
    %c0_416 = arith.constant 0 : index
    %617 = vector.load %arg4[%c7_414, %c5_415, %c0_416] : memref<8x8x128xf32, #tpu.memory_space<vmem>>, vector<1x1x128xf32>
    %618 = vector.shape_cast %617 : vector<1x1x128xf32> to vector<128xf32>
    %619 = vector.shape_cast %616 : vector<128xf32> to vector<1x1x128xf32>
    tpu.vector_store %arg4[%c7_414, %c5_415, %c0_416], %619 {strides = array<i32>} : memref<8x8x128xf32, #tpu.memory_space<vmem>>, vector<1x1x128xf32>,
    %c8_i32_417 = arith.constant 8 : i32
    %620 = arith.muli %arg0, %c8_i32_417 : i32
    %c7_i32_418 = arith.constant 7 : i32
    %621 = arith.addi %620, %c7_i32_418 : i32
    %622 = arith.index_cast %621 : i32 to index
    %c6_419 = arith.constant 6 : index
    %623 = memref.load %arg1[%622, %c6_419] : memref<16x8xi32, #tpu.memory_space<smem>>
    %624 = arith.index_cast %623 : i32 to index
    %c0_420 = arith.constant 0 : index
    %625 = vector.load %arg2[%624, %c0_420] : memref<32x128xf32, #tpu.memory_space<vmem>>, vector<1x128xf32>
    %626 = vector.shape_cast %625 : vector<1x128xf32> to vector<128xf32>
    %c7_421 = arith.constant 7 : index
    %c6_422 = arith.constant 6 : index
    %c0_423 = arith.constant 0 : index
    %627 = vector.load %arg4[%c7_421, %c6_422, %c0_423] : memref<8x8x128xf32, #tpu.memory_space<vmem>>, vector<1x1x128xf32>
    %628 = vector.shape_cast %627 : vector<1x1x128xf32> to vector<128xf32>
    %629 = vector.shape_cast %626 : vector<128xf32> to vector<1x1x128xf32>
    tpu.vector_store %arg4[%c7_421, %c6_422, %c0_423], %629 {strides = array<i32>} : memref<8x8x128xf32, #tpu.memory_space<vmem>>, vector<1x1x128xf32>,
    %c8_i32_424 = arith.constant 8 : i32
    %630 = arith.muli %arg0, %c8_i32_424 : i32
    %c7_i32_425 = arith.constant 7 : i32
    %631 = arith.addi %630, %c7_i32_425 : i32
    %632 = arith.index_cast %631 : i32 to index
    %c7_426 = arith.constant 7 : index
    %633 = memref.load %arg1[%632, %c7_426] : memref<16x8xi32, #tpu.memory_space<smem>>
    %634 = arith.index_cast %633 : i32 to index
    %c0_427 = arith.constant 0 : index
    %635 = vector.load %arg2[%634, %c0_427] : memref<32x128xf32, #tpu.memory_space<vmem>>, vector<1x128xf32>
    %636 = vector.shape_cast %635 : vector<1x128xf32> to vector<128xf32>
    %c7_428 = arith.constant 7 : index
    %c7_429 = arith.constant 7 : index
    %c0_430 = arith.constant 0 : index
    %637 = vector.load %arg4[%c7_428, %c7_429, %c0_430] : memref<8x8x128xf32, #tpu.memory_space<vmem>>, vector<1x1x128xf32>
    %638 = vector.shape_cast %637 : vector<1x1x128xf32> to vector<128xf32>
    %639 = vector.shape_cast %636 : vector<128xf32> to vector<1x1x128xf32>
    tpu.vector_store %arg4[%c7_428, %c7_429, %c0_430], %639 {strides = array<i32>} : memref<8x8x128xf32, #tpu.memory_space<vmem>>, vector<1x1x128xf32>,
    %c0_431 = arith.constant 0 : index
    %c0_432 = arith.constant 0 : index
    %c0_433 = arith.constant 0 : index
    %640 = vector.load %arg4[%c0_431, %c0_432, %c0_433] : memref<8x8x128xf32, #tpu.memory_space<vmem>>, vector<8x8x128xf32>
    %641 = arith.mulf %640, %640 : vector<8x8x128xf32>
    %cst = arith.constant dense<0.000000e+00> : vector<8x8xf32>
    %642 = vector.multi_reduction <add>, %641, %cst [2] : vector<8x8x128xf32> to vector<8x8xf32>
    %643 = vector.shape_cast %642 : vector<8x8xf32> to vector<8x8x1xf32>
    %cst_434 = arith.constant 0.000000e+00 : f32
    %644 = vector.broadcast %cst_434 : f32 to vector<8x8x1xf32>
    %645 = arith.cmpf ogt, %643, %644 : vector<8x8x1xf32>
    %cst_435 = arith.constant 0.000000e+00 : f32
    %646 = vector.broadcast %cst_435 : f32 to vector<8x8x1xf32>
    %647 = arith.maximumf %643, %646 : vector<8x8x1xf32>
    %648 = math.rsqrt %647 : vector<8x8x1xf32>
    %cst_436 = arith.constant 0.000000e+00 : f32
    %649 = vector.broadcast %cst_436 : f32 to vector<8x8x1xf32>
    %650 = arith.select %645, %648, %649 : vector<8x8x1xi1>, vector<8x8x1xf32>
    %651 = vector.broadcast %650 : vector<8x8x1xf32> to vector<8x8x128xf32>
    %652 = arith.mulf %640, %651 : vector<8x8x128xf32>
    %cst_437 = arith.constant dense<0.000000e+00> : vector<8x128xf32>
    %653 = vector.multi_reduction <add>, %652, %cst_437 [1] : vector<8x8x128xf32> to vector<8x128xf32>
    %654 = arith.extui %645 : vector<8x8x1xi1> to vector<8x8x1xi32>
    %655 = arith.sitofp %654 : vector<8x8x1xi32> to vector<8x8x1xf32>
    %cst_438 = arith.constant dense<0.000000e+00> : vector<8x1xf32>
    %656 = vector.multi_reduction <add>, %655, %cst_438 [1] : vector<8x8x1xf32> to vector<8x1xf32>
    %cst_439 = arith.constant 1.000000e+00 : f32
    %657 = vector.broadcast %cst_439 : f32 to vector<8x1xf32>
    %658 = arith.maximumf %656, %657 : vector<8x1xf32>
    %659 = tpu.reciprocal %658 {approx = true} : vector<8x1xf32> -> vector<8x1xf32>
    %660 = vector.broadcast %659 : vector<8x1xf32> to vector<8x128xf32>
    %661 = arith.mulf %653, %660 : vector<8x128xf32>
    %c0_440 = arith.constant 0 : index
    %c0_441 = arith.constant 0 : index
    %662 = vector.load %arg3[%c0_440, %c0_441] : memref<8x128xf32, #tpu.memory_space<vmem>>, vector<8x128xf32>
    tpu.vector_store %arg3[%c0_440, %c0_441], %661 {strides = array<i32>} : memref<8x128xf32, #tpu.memory_space<vmem>>, vector<8x128xf32>,
    return
  }
  func.func @transform_0(%arg0: i32, %arg1: memref<16x8xi32, #tpu.memory_space<smem>>) -> (i32, i32) {
    %c0_i32 = arith.constant 0 : i32
    %c0_i32_0 = arith.constant 0 : i32
    %c0_i32_1 = arith.constant 0 : i32
    return %c0_i32, %c0_i32_0 : i32, i32
  }
  func.func @transform_1(%arg0: i32, %arg1: memref<16x8xi32, #tpu.memory_space<smem>>) -> (i32, i32) {
    %c0_i32 = arith.constant 0 : i32
    %c0_i32_0 = arith.constant 0 : i32
    return %arg0, %c0_i32 : i32, i32
  }
}

</mosaic_0001>

<bundles_post_ra>
// kernel: tpu_custom_call.1
= control target key start
LH: loop header
LB: loop body
LE: loop exit
PB: predicated region body
PF: predicated region fallthrough
CT: control target
= control target key end

     0   :  { %s1146_s12 = smov [#allocation4]   ;;  %s1558_s0 = inlined_call_operand.vmem [shape: s32[16,8], index: 0, kind: input, shape index: {}]   ;;  %s1559_s1 = inlined_call_operand.hbm [shape: f32[32,128], index: 1, kind: input, shape index: {}]   ;;  %s1560_s2 = inlined_call_operand.hbm [shape: f32[16,128], index: 2, kind: output, shape index: {}]  }
   0x1   :  { %s8_s11 = sshll.u32 %s1558_s0, 4  ;;  %s9_s11 = int_to_ptr.vmem [resolvable:$true] %s8_s11 }
   0x2   :  { %11 = dma.vmem_to_smem %s9_s11, 256, %s1146_s12, [#allocation3] }
   0x3   :  { %1120 = dma.done.wait [#allocation3], 256 }
   0x4   :  { %1121 = vsyncadd [#allocation3], 4294967040 }
   0x5   :  { %14 = sfence }
   0x6   :  { %15 = vsyncpa [#allocation6], 0 }
   0x7   :  { %16 = vsyncpa [#allocation7], 0 }
   0x8   :  { %18 = vsyncpa [#allocation7 + $0x1], 0  ;;  %s1169_s13 = smov 0   ;;  %s1171_s14 = smov 0  }
   0x9   :  { %s1173_s15 = smov 0   ;;  %s1175_s16 = smov 0  }
   0xa LB: > { %s1190_s0 = sadd.s32 4294967295, %s1144_s16   ;;  %s899_s17 = sadd.s32 4294967294, %s1144_s16   ;;  %s1144_s16 = sphi %s1175_s16, %s1574_s16   ;;  %s1140_s15 = sphi %s1173_s15, %s1573_s15   ;;  %s1136_s14 = sphi %s1171_s14, %s1572_s14   ;;  %s1132_s13 = sphi %s1169_s13, %s1571_s13  }
   0xb   : > { %s1194_s18 = sadd.s32 1, %s1144_s16   ;;  %s52_s19 = sadd.s32 1, %s1140_s15 }
   0xc   : > { %s49_s20 = ssub.s32 %s1144_s16, %s1194_s18  ;;  %p62_p0 = scmp.ne.s32.totalorder %s1140_s15, %s1136_s14 }
   0xd   : > { %p50_p1 = scmp.eq.s32.totalorder %s49_s20, 0  ;;  %p63_p2 = scmp.eq.s32.totalorder %s1190_s0, 1 }
   0xe   : > { %p68_p3 = scmp.ne.s32.totalorder %s1136_s14, %s1132_s13  ;;  %p69_p4 = scmp.eq.s32.totalorder %s899_s17, 1 }
   0xf   : > { %s1205_s21 = scalar_select %p50_p1, %s1140_s15, %s52_s19  }
  0x10   : > { %p1207_p5 = por %p63_p2, %p62_p0  ;;  %p1211_p6 = por %p69_p4, %p68_p3 }
  0x11   : > { %p900_p7 = scmp.ge.s32.totalorder %s1144_s16, 1  ;;  %p76_p8 = scmp.lt.s32.totalorder %s1144_s16, 3 }
  0x12   : > { %p962_p9 = scmp.eq.s32.totalorder %s1190_s0, 0  ;;  %s87_s26 = sshll.u32 %s1559_s1, 4  ;;  %s88_s26 = int_to_ptr.hbm [resolvable:$true] %s87_s26 }
  0x13   : > { %p77_p10 = pnand %p900_p7, %p76_p8  ;;  %s1147_s27 = smov [#allocation5]  }
  0x14   : > { %s89_s28 = sshll.u32 %s1147_s27, 4  ;;  %s1148_s29 = smov 128   ;;  %s90_s28 = int_to_ptr.vmem [resolvable:$true] %s89_s28 }
  0x15   : > { %p954_p11 = pneg %p77_p10  ;;  %s1149_s30 = smov 8  }
  0x16   : > { %105 = sbr.rel (%p77_p10) target bundleno = 297 (0x129), region = 24 }
  0x17   : > { %p955_p12 = pnand %p962_p9, %p954_p11 }
  0x19   : > { %957 = dma.hbm_to_vmem [thread:$0]  (!%p955_p12), %s88_s26, 512, %s90_s28, [#allocation6], %s1148_s29, %s1148_s29, %s1149_s30  }
  0x1b   : > { %1123 = dma.done.wait (%p962_p9), [#allocation6], 512  }
  0x1c   : > { %1125 = vsyncadd (%p962_p9), [#allocation6], 4294966784  ;;  %s1228_s3 = sshll.u32 %s1190_s0, 10 }
  0x1d   : > { %s123_s4 = sld [smem:[#allocation4 + %s1228_s3]]  ;;  %s127_s5 = sadd.s32 1, %s1228_s3 }
  0x1e   : > { %s128_s6 = sld [smem:[#allocation4 + %s127_s5]]  ;;  %s132_s7 = sadd.s32 2, %s1228_s3 }
  0x1f   : > { %s133_s8 = sld [smem:[#allocation4 + %s132_s7]]  ;;  %s137_s9 = sadd.s32 3, %s1228_s3 }
  0x20   : > { %s138_s10 = sld [smem:[#allocation4 + %s137_s9]]  ;;  %s142_s11 = sadd.s32 4, %s1228_s3 }
  0x21   : > { %s143_s12 = sld [smem:[#allocation4 + %s142_s11]]  ;;  %s147_s17 = sadd.s32 5, %s1228_s3 }
  0x22   : > { %s148_s19 = sld [smem:[#allocation4 + %s147_s17]]  ;;  %s152_s20 = sadd.s32 6, %s1228_s3 }
  0x23   : > { %s153_s24 = sld [smem:[#allocation4 + %s152_s20]]  ;;  %s124_s25 = scalar_lea.vmem [#allocation5], %s123_s4 }
  0x24   : > { %v125_v0 = vld [vmem:[%s124_s25] sm:$0x1]  ;;  %s157_s26 = sadd.s32 7, %s1228_s3  ;;  %s129_s27 = scalar_lea.vmem [#allocation5], %s128_s6 }
  0x25   : > { %126 = vst [vmem:[#allocation2] sm:$0x1] %v125_v0  ;;  %v130_v1 = vld [vmem:[%s129_s27] sm:$0x1]  ;;  %s158_s28 = sld [smem:[#allocation4 + %s157_s26]]  ;;  %s134_s29 = scalar_lea.vmem [#allocation5], %s133_s8 }
  0x26   : > { %131 = vst [vmem:[#allocation2 + $0x1] sm:$0x1] %v130_v1  ;;  %v135_v2 = vld [vmem:[%s134_s29] sm:$0x1]  ;;  %s1239_s30 = sadd.s32 512, %s1228_s3  ;;  %s139_s5 = scalar_lea.vmem [#allocation5], %s138_s10 }
  0x27   : > { %136 = vst [vmem:[#allocation2 + $0x2] sm:$0x1] %v135_v2  ;;  %v140_v3 = vld [vmem:[%s139_s5] sm:$0x1]  ;;  %s290_s7 = sld [smem:[#allocation4 + %s1239_s30]]  ;;  %s144_s4 = scalar_lea.vmem [#allocation5], %s143_s12 }
  0x28   : > { %141 = vst [vmem:[#allocation2 + $0x3] sm:$0x1] %v140_v3  ;;  %v145_v4 = vld [vmem:[%s144_s4] sm:$0x1]  ;;  %s295_s6 = sadd.s32 1, %s1239_s30  ;;  %s149_s9 = scalar_lea.vmem [#allocation5], %s148_s19 }
  0x29   : > { %146 = vst [vmem:[#allocation2 + $0x4] sm:$0x1] %v145_v4  ;;  %v150_v5 = vld [vmem:[%s149_s9] sm:$0x1]  ;;  %s296_s8 = sld [smem:[#allocation4 + %s295_s6]]  ;;  %s154_s11 = scalar_lea.vmem [#allocation5], %s153_s24 }
  0x2a   : > { %151 = vst [vmem:[#allocation2 + $0x5] sm:$0x1] %v150_v5  ;;  %v155_v6 = vld [vmem:[%s154_s11] sm:$0x1]  ;;  %s300_s17 = sadd.s32 2, %s1239_s30  ;;  %s305_s20 = sadd.s32 3, %s1239_s30 }
  0x2b   : > { %156 = vst [vmem:[#allocation2 + $0x6] sm:$0x1] %v155_v6  ;;  %s301_s10 = sld [smem:[#allocation4 + %s300_s17]]  ;;  %s159_s25 = scalar_lea.vmem [#allocation5], %s158_s28 }
  0x2c   : > { %v160_v7 = vld [vmem:[%s159_s25] sm:$0x1]  ;;  %s306_s12 = sld [smem:[#allocation4 + %s305_s20]]  ;;  %s310_s26 = sadd.s32 4, %s1239_s30 }
  0x2d   : > { %161 = vst [vmem:[#allocation2 + $0x7] sm:$0x1] %v160_v7  ;;  %s311_s27 = sld [smem:[#allocation4 + %s310_s26]]  ;;  %s291_s19 = scalar_lea.vmem [#allocation5], %s290_s7 }
  0x2e   : > { %v292_v8 = vld [vmem:[%s291_s19] sm:$0x1]  ;;  %s315_s29 = sadd.s32 5, %s1239_s30  ;;  %s320_s5 = sadd.s32 6, %s1239_s30 }
  0x2f   : > { %294 = vst [vmem:[#allocation2 + $0x20] sm:$0x1] %v292_v8  ;;  %s316_s4 = sld [smem:[#allocation4 + %s315_s29]]  ;;  %s297_s24 = scalar_lea.vmem [#allocation5], %s296_s8 }
  0x30   : > { %v298_v9 = vld [vmem:[%s297_s24] sm:$0x1]  ;;  %s321_s6 = sld [smem:[#allocation4 + %s320_s5]]  ;;  %s325_s9 = sadd.s32 7, %s1239_s30 }
  0x31   : > { %299 = vst [vmem:[#allocation2 + $0x21] sm:$0x1] %v298_v9  ;;  %s326_s11 = sld [smem:[#allocation4 + %s325_s9]]  ;;  %s302_s17 = scalar_lea.vmem [#allocation5], %s301_s10 }
  0x32   : > { %v303_v10 = vld [vmem:[%s302_s17] sm:$0x1]  ;;  %s1250_s28 = sadd.s32 256, %s1228_s3  ;;  %s307_s7 = scalar_lea.vmem [#allocation5], %s306_s12 }
  0x33   : > { %304 = vst [vmem:[#allocation2 + $0x22] sm:$0x1] %v303_v10  ;;  %v308_v11 = vld [vmem:[%s307_s7] sm:$0x1]  ;;  %s206_s20 = sld [smem:[#allocation4 + %s1250_s28]]  ;;  %s312_s8 = scalar_lea.vmem [#allocation5], %s311_s27 }
  0x34   : > { %v1253_v12 = vld [vmem:[#allocation2] sm:$0xff]  ;;  %309 = vst [vmem:[#allocation2 + $0x23] sm:$0x1] %v308_v11  ;;  %s211_s30 = sadd.s32 1, %s1250_s28  ;;  %s216_s26 = sadd.s32 2, %s1250_s28 }
  0x35   : > { %v313_v13 = vld [vmem:[%s312_s8] sm:$0x1]  ;;  %v464_v14 = vmul.f32 %v1253_v12, %v1253_v12  ;;  %s212_s10 = sld [smem:[#allocation4 + %s211_s30]]  ;;  %s317_s25 = scalar_lea.vmem [#allocation5], %s316_s4 }
  0x36   : > { %314 = vst [vmem:[#allocation2 + $0x24] sm:$0x1] %v313_v13  ;;  %v318_v15 = vld [vmem:[%s317_s25] sm:$0x1]  ;;  %s322_s12 = scalar_lea.vmem [#allocation5], %s321_s6  ;;  %s217_s19 = sld [smem:[#allocation4 + %s216_s26]] }
  0x37   : > { %472 = vadd.xlane.f32.xlu0 %v464_v14  ;;  %319 = vst [vmem:[#allocation2 + $0x25] sm:$0x1] %v318_v15  ;;  %v323_v16 = vld [vmem:[%s322_s12] sm:$0x1]  ;;  %s327_s27 = scalar_lea.vmem [#allocation5], %s326_s11  ;;  %s221_s29 = sadd.s32 3, %s1250_s28 }
  0x38   : > { %324 = vst [vmem:[#allocation2 + $0x26] sm:$0x1] %v323_v16  ;;  %v328_v17 = vld [vmem:[%s327_s27] sm:$0x1]  ;;  %s226_s5 = sadd.s32 4, %s1250_s28  ;;  %s222_s24 = sld [smem:[#allocation4 + %s221_s29]] }
  0x39   : > { %329 = vst [vmem:[#allocation2 + $0x27] sm:$0x1] %v328_v17  ;;  %s207_s9 = scalar_lea.vmem [#allocation5], %s206_s20  ;;  %s227_s4 = sld [smem:[#allocation4 + %s226_s5]] }
  0x3a   : > { %v208_v18 = vld [vmem:[%s207_s9] sm:$0x1]  ;;  %s231_s17 = sadd.s32 5, %s1250_s28  ;;  %s236_s6 = sadd.s32 6, %s1250_s28 }
  0x3b   : > { %210 = vst [vmem:[#allocation2 + $0x10] sm:$0x1] %v208_v18  ;;  %s232_s7 = sld [smem:[#allocation4 + %s231_s17]]  ;;  %s213_s8 = scalar_lea.vmem [#allocation5], %s212_s10 }
  0x3c   : > { %v214_v19 = vld [vmem:[%s213_s8] sm:$0x1]  ;;  %s241_s30 = sadd.s32 7, %s1250_s28  ;;  %s237_s25 = sld [smem:[#allocation4 + %s236_s6]] }
  0x3d   : > { %215 = vst [vmem:[#allocation2 + $0x11] sm:$0x1] %v214_v19  ;;  %s218_s26 = scalar_lea.vmem [#allocation5], %s217_s19  ;;  %s242_s11 = sld [smem:[#allocation4 + %s241_s30]] }
  0x3e   : > { %v219_v20 = vld [vmem:[%s218_s26] sm:$0x1]  ;;  %s1265_s12 = sadd.s32 128, %s1228_s3  ;;  %s223_s27 = scalar_lea.vmem [#allocation5], %s222_s24 }
  0x3f   : > { %220 = vst [vmem:[#allocation2 + $0x12] sm:$0x1] %v219_v20  ;;  %s164_s20 = sld [smem:[#allocation4 + %s1265_s12]]  ;;  %v224_v22 = vld [vmem:[%s223_s27] sm:$0x1]  ;;  %s169_s10 = sadd.s32 1, %s1265_s12 }
  0x40   : > { %v1268_v21 = vld [vmem:[#allocation2 + $0x20] sm:$0xff]  ;;  %225 = vst [vmem:[#allocation2 + $0x13] sm:$0x1] %v224_v22  ;;  %s228_s28 = scalar_lea.vmem [#allocation5], %s227_s4  ;;  %s170_s19 = sld [smem:[#allocation4 + %s169_s10]] }
  0x41   : > { %v468_v23 = vmul.f32 %v1268_v21, %v1268_v21  ;;  %v229_v24 = vld [vmem:[%s228_s28] sm:$0x1]  ;;  %s233_s29 = scalar_lea.vmem [#allocation5], %s232_s7  ;;  %s174_s5 = sadd.s32 2, %s1265_s12 }
  0x42   : > { %230 = vst [vmem:[#allocation2 + $0x14] sm:$0x1] %v229_v24  ;;  %v234_v25 = vld [vmem:[%s233_s29] sm:$0x1]  ;;  %s179_s9 = sadd.s32 3, %s1265_s12  ;;  %s175_s17 = sld [smem:[#allocation4 + %s174_s5]] }
  0x43   : > { %480 = vadd.xlane.f32.xlu2 %v468_v23  ;;  %235 = vst [vmem:[#allocation2 + $0x15] sm:$0x1] %v234_v25  ;;  %s238_s24 = scalar_lea.vmem [#allocation5], %s237_s25  ;;  %s180_s8 = sld [smem:[#allocation4 + %s179_s9]] }
  0x44   : > { %v239_v26 = vld [vmem:[%s238_s24] sm:$0x1]  ;;  %s243_s6 = scalar_lea.vmem [#allocation5], %s242_s11  ;;  %s184_s4 = sadd.s32 4, %s1265_s12 }
  0x45   : > { %240 = vst [vmem:[#allocation2 + $0x16] sm:$0x1] %v239_v26  ;;  %v244_v27 = vld [vmem:[%s243_s6] sm:$0x1]  ;;  %s165_s30 = scalar_lea.vmem [#allocation5], %s164_s20  ;;  %s185_s7 = sld [smem:[#allocation4 + %s184_s4]] }
  0x46   : > { %245 = vst [vmem:[#allocation2 + $0x17] sm:$0x1] %v244_v27  ;;  %v166_v28 = vld [vmem:[%s165_s30] sm:$0x1]  ;;  %s189_s26 = sadd.s32 5, %s1265_s12  ;;  %s171_s10 = scalar_lea.vmem [#allocation5], %s170_s19 }
  0x47   : > { %168 = vst [vmem:[#allocation2 + $0x8] sm:$0x1] %v166_v28  ;;  %s190_s27 = sld [smem:[#allocation4 + %s189_s26]]  ;;  %v172_v29 = vld [vmem:[%s171_s10] sm:$0x1]  ;;  %s194_s25 = sadd.s32 6, %s1265_s12 }
  0x48   : > { %s199_s28 = sadd.s32 7, %s1265_s12  ;;  %173 = vst [vmem:[#allocation2 + $0x9] sm:$0x1] %v172_v29  ;;  %s195_s29 = sld [smem:[#allocation4 + %s194_s25]]  ;;  %v1150_v28 = vmov 0.0  }
  0x49   : > { %s176_s5 = scalar_lea.vmem [#allocation5], %s175_s17  ;;  %s200_s11 = sld [smem:[#allocation4 + %s199_s28]] }
  0x4a   : > { %v177_v30 = vld [vmem:[%s176_s5] sm:$0x1]  ;;  %s181_s9 = scalar_lea.vmem [#allocation5], %s180_s8  ;;  %s1280_s20 = sadd.s32 640, %s1228_s3 }
  0x4b   : > { %178 = vst [vmem:[#allocation2 + $0xa] sm:$0x1] %v177_v30  ;;  %v182_v31 = vld [vmem:[%s181_s9] sm:$0x1]  ;;  %s1283_s24 = sadd.s32 384, %s1228_s3  ;;  %s332_s19 = sld [smem:[#allocation4 + %s1280_s20]] }
  0x4c   : > { %183 = vst [vmem:[#allocation2 + $0xb] sm:$0x1] %v182_v31  ;;  %s186_s12 = scalar_lea.vmem [#allocation5], %s185_s7  ;;  %s337_s17 = sadd.s32 1, %s1280_s20 }
  0x4d   : > { %v1286_v32 = vld [vmem:[#allocation2 + $0x10] sm:$0xff]  ;;  %v187_v33 = vld [vmem:[%s186_s12] sm:$0x1]  ;;  %s191_s8 = scalar_lea.vmem [#allocation5], %s190_s27  ;;  %s338_s6 = sld [smem:[#allocation4 + %s337_s17]] }
  0x4e   : > { %v466_v34 = vmul.f32 %v1286_v32, %v1286_v32  ;;  %188 = vst [vmem:[#allocation2 + $0xc] sm:$0x1] %v187_v33  ;;  %v192_v35 = vld [vmem:[%s191_s8] sm:$0x1]  ;;  %s342_s4 = sadd.s32 2, %s1280_s20  ;;  %s196_s26 = scalar_lea.vmem [#allocation5], %s195_s29 }
  0x4f   : > { %193 = vst [vmem:[#allocation2 + $0xd] sm:$0x1] %v192_v35  ;;  %s343_s30 = sld [smem:[#allocation4 + %s342_s4]]  ;;  %v197_v36 = vld [vmem:[%s196_s26] sm:$0x1]  ;;  %s347_s10 = sadd.s32 3, %s1280_s20 }
  0x50   : > { %476 = vadd.xlane.f32.xlu1 %v466_v34  ;;  %198 = vst [vmem:[#allocation2 + $0xe] sm:$0x1] %v197_v36  ;;  %s201_s7 = scalar_lea.vmem [#allocation5], %s200_s11  ;;  %s348_s25 = sld [smem:[#allocation4 + %s347_s10]] }
  0x51   : > { %v202_v37 = vld [vmem:[%s201_s7] sm:$0x1]  ;;  %s352_s28 = sadd.s32 4, %s1280_s20  ;;  %s333_s5 = scalar_lea.vmem [#allocation5], %s332_s19 }
  0x52   : > { %203 = vst [vmem:[#allocation2 + $0xf] sm:$0x1] %v202_v37  ;;  %s353_s27 = sld [smem:[#allocation4 + %s352_s28]]  ;;  %v334_v38 = vld [vmem:[%s333_s5] sm:$0x1]  ;;  %s357_s9 = sadd.s32 5, %s1280_s20 }
  0x53   : > { %s362_s12 = sadd.s32 6, %s1280_s20  ;;  %336 = vst [vmem:[#allocation2 + $0x28] sm:$0x1] %v334_v38  ;;  %s358_s17 = sld [smem:[#allocation4 + %s357_s9]] }
  0x54   : > { %s339_s8 = scalar_lea.vmem [#allocation5], %s338_s6  ;;  %s363_s29 = sld [smem:[#allocation4 + %s362_s12]] }
  0x55   : > { %v340_v39 = vld [vmem:[%s339_s8] sm:$0x1]  ;;  %s344_s4 = scalar_lea.vmem [#allocation5], %s343_s30  ;;  %s367_s11 = sadd.s32 7, %s1280_s20 }
  0x56   : > { %341 = vst [vmem:[#allocation2 + $0x29] sm:$0x1] %v340_v39  ;;  %v345_v40 = vld [vmem:[%s344_s4] sm:$0x1]  ;;  %s248_s26 = sld [smem:[#allocation4 + %s1283_s24]]  ;;  %s349_s7 = scalar_lea.vmem [#allocation5], %s348_s25 }
  0x57   : > { %346 = vst [vmem:[#allocation2 + $0x2a] sm:$0x1] %v345_v40  ;;  %s368_s10 = sld [smem:[#allocation4 + %s367_s11]]  ;;  %v350_v41 = vld [vmem:[%s349_s7] sm:$0x1]  ;;  %s253_s19 = sadd.s32 1, %s1283_s24 }
  0x58   : > { %351 = vst [vmem:[#allocation2 + $0x2b] sm:$0x1] %v350_v41  ;;  %s354_s28 = scalar_lea.vmem [#allocation5], %s353_s27  ;;  %s254_s6 = sld [smem:[#allocation4 + %s253_s19]] }
  0x59   : > { %v1299_v42 = vld [vmem:[#allocation2 + $0x8] sm:$0xff]  ;;  %v355_v43 = vld [vmem:[%s354_s28] sm:$0x1]  ;;  %s258_s30 = sadd.s32 2, %s1283_s24  ;;  %s359_s20 = scalar_lea.vmem [#allocation5], %s358_s17 }
  0x5a   : > { %v465_v44 = vmul.f32 %v1299_v42, %v1299_v42  ;;  %356 = vst [vmem:[#allocation2 + $0x2c] sm:$0x1] %v355_v43  ;;  %v360_v45 = vld [vmem:[%s359_s20] sm:$0x1]  ;;  %s259_s5 = sld [smem:[#allocation4 + %s258_s30]]  ;;  %s364_s25 = scalar_lea.vmem [#allocation5], %s363_s29 }
  0x5b   : > { %361 = vst [vmem:[#allocation2 + $0x2d] sm:$0x1] %v360_v45  ;;  %v365_v46 = vld [vmem:[%s364_s25] sm:$0x1]  ;;  %s263_s9 = sadd.s32 3, %s1283_s24  ;;  %s268_s4 = sadd.s32 4, %s1283_s24 }
  0x5c   : > { %474 = vadd.xlane.f32.xlu0 %v465_v44  ;;  %366 = vst [vmem:[#allocation2 + $0x2e] sm:$0x1] %v365_v46  ;;  %s249_s27 = scalar_lea.vmem [#allocation5], %s248_s26  ;;  %s264_s12 = sld [smem:[#allocation4 + %s263_s9]] }
  0x5d   : > { %v250_v47 = vld [vmem:[%s249_s27] sm:$0x1]  ;;  %s369_s8 = scalar_lea.vmem [#allocation5], %s368_s10  ;;  %s273_s17 = sadd.s32 5, %s1283_s24 }
  0x5e   : > { %v370_v48 = vld [vmem:[%s369_s8] sm:$0x1]  ;;  %252 = vst [vmem:[#allocation2 + $0x18] sm:$0x1] %v250_v47  ;;  %s269_s11 = sld [smem:[#allocation4 + %s268_s4]]  ;;  %s255_s7 = scalar_lea.vmem [#allocation5], %s254_s6 }
  0x5f   : > { %371 = vst [vmem:[#allocation2 + $0x2f] sm:$0x1] %v370_v48  ;;  %v256_v49 = vld [vmem:[%s255_s7] sm:$0x1]  ;;  %s274_s19 = sld [smem:[#allocation4 + %s273_s17]]  ;;  %s278_s29 = sadd.s32 6, %s1283_s24 }
  0x60   : > { %257 = vst [vmem:[#allocation2 + $0x19] sm:$0x1] %v256_v49  ;;  %s279_s28 = sld [smem:[#allocation4 + %s278_s29]]  ;;  %s260_s30 = scalar_lea.vmem [#allocation5], %s259_s5 }
  0x61   : > { %v261_v50 = vld [vmem:[%s260_s30] sm:$0x1]  ;;  %s283_s26 = sadd.s32 7, %s1283_s24  ;;  %s1310_s20 = sadd.s32 768, %s1228_s3 }
  0x62   : > { %262 = vst [vmem:[#allocation2 + $0x1a] sm:$0x1] %v261_v50  ;;  %s284_s10 = sld [smem:[#allocation4 + %s283_s26]]  ;;  %s265_s25 = scalar_lea.vmem [#allocation5], %s264_s12 }
  0x63   : > { %v266_v51 = vld [vmem:[%s265_s25] sm:$0x1]  ;;  %s374_s9 = sld [smem:[#allocation4 + %s1310_s20]]  ;;  %s379_s6 = sadd.s32 1, %s1310_s20 }
  0x64   : > { %267 = vst [vmem:[#allocation2 + $0x1b] sm:$0x1] %v266_v51  ;;  %s380_s27 = sld [smem:[#allocation4 + %s379_s6]]  ;;  %s270_s5 = scalar_lea.vmem [#allocation5], %s269_s11 }
  0x65   : > { %v271_v53 = vld [vmem:[%s270_s5] sm:$0x1]  ;;  %s384_s24 = sadd.s32 2, %s1310_s20  ;;  %s275_s8 = scalar_lea.vmem [#allocation5], %s274_s19 }
  0x66   : > { %v1314_v52 = vld [vmem:[#allocation2 + $0x28] sm:$0xff]  ;;  %272 = vst [vmem:[#allocation2 + $0x1c] sm:$0x1] %v271_v53  ;;  %v276_v55 = vld [vmem:[%s275_s8] sm:$0x1]  ;;  %s385_s12 = sld [smem:[#allocation4 + %s384_s24]] }
  0x67   : > { %v469_v54 = vmul.f32 %v1314_v52, %v1314_v52  ;;  %277 = vst [vmem:[#allocation2 + $0x1d] sm:$0x1] %v276_v55  ;;  %s280_s4 = scalar_lea.vmem [#allocation5], %s279_s28  ;;  %s389_s17 = sadd.s32 3, %s1310_s20 }
  0x68   : > { %v281_v56 = vld [vmem:[%s280_s4] sm:$0x1]  ;;  %s394_s7 = sadd.s32 4, %s1310_s20  ;;  %s390_s29 = sld [smem:[#allocation4 + %s389_s17]] }
  0x69   : > { %482 = vadd.xlane.f32.xlu2 %v469_v54  ;;  %282 = vst [vmem:[#allocation2 + $0x1e] sm:$0x1] %v281_v56  ;;  %s285_s11 = scalar_lea.vmem [#allocation5], %s284_s10  ;;  %s395_s30 = sld [smem:[#allocation4 + %s394_s7]] }
  0x6a   : > { %v286_v57 = vld [vmem:[%s285_s11] sm:$0x1]  ;;  %s375_s26 = scalar_lea.vmem [#allocation5], %s374_s9  ;;  %s399_s19 = sadd.s32 5, %s1310_s20 }
  0x6b   : > { %287 = vst [vmem:[#allocation2 + $0x1f] sm:$0x1] %v286_v57  ;;  %v376_v58 = vld [vmem:[%s375_s26] sm:$0x1]  ;;  %s381_s25 = scalar_lea.vmem [#allocation5], %s380_s27  ;;  %s400_s28 = sld [smem:[#allocation4 + %s399_s19]] }
  0x6c   : > { %378 = vst [vmem:[#allocation2 + $0x30] sm:$0x1] %v376_v58  ;;  %v382_v59 = vld [vmem:[%s381_s25] sm:$0x1]  ;;  %s404_s6 = sadd.s32 6, %s1310_s20  ;;  %s386_s24 = scalar_lea.vmem [#allocation5], %s385_s12 }
  0x6d   : > { %383 = vst [vmem:[#allocation2 + $0x31] sm:$0x1] %v382_v59  ;;  %s405_s5 = sld [smem:[#allocation4 + %s404_s6]]  ;;  %v387_v60 = vld [vmem:[%s386_s24] sm:$0x1]  ;;  %s409_s8 = sadd.s32 7, %s1310_s20 }
  0x6e   : > { %s1325_s4 = sadd.s32 896, %s1228_s3  ;;  %388 = vst [vmem:[#allocation2 + $0x32] sm:$0x1] %v387_v60  ;;  %s410_s10 = sld [smem:[#allocation4 + %s409_s8]] }
  0x6f   : > { %s391_s9 = scalar_lea.vmem [#allocation5], %s390_s29  ;;  %s416_s17 = sld [smem:[#allocation4 + %s1325_s4]] }
  0x70   : > { %v392_v61 = vld [vmem:[%s391_s9] sm:$0x1]  ;;  %s396_s27 = scalar_lea.vmem [#allocation5], %s395_s30  ;;  %s421_s7 = sadd.s32 1, %s1325_s4 }
  0x71   : > { %393 = vst [vmem:[#allocation2 + $0x33] sm:$0x1] %v392_v61  ;;  %v397_v62 = vld [vmem:[%s396_s27] sm:$0x1]  ;;  %s426_s11 = sadd.s32 2, %s1325_s4  ;;  %s422_s3 = sld [smem:[#allocation4 + %s421_s7]] }
  0x72   : > { %v1330_v63 = vld [vmem:[#allocation2 + $0x18] sm:$0xff]  ;;  %398 = vst [vmem:[#allocation2 + $0x34] sm:$0x1] %v397_v62  ;;  %s401_s20 = scalar_lea.vmem [#allocation5], %s400_s28  ;;  %s427_s12 = sld [smem:[#allocation4 + %s426_s11]] }
  0x73   : > { %v467_v0 = vmul.f32 %v1330_v63, %v1330_v63  ;;  %v402_v1 = vld [vmem:[%s401_s20] sm:$0x1]  ;;  %s406_s29 = scalar_lea.vmem [#allocation5], %s405_s5  ;;  %s431_s26 = sadd.s32 3, %s1325_s4 }
  0x74   : > { %403 = vst [vmem:[#allocation2 + $0x35] sm:$0x1] %v402_v1  ;;  %v407_v2 = vld [vmem:[%s406_s29] sm:$0x1]  ;;  %s436_s30 = sadd.s32 4, %s1325_s4  ;;  %s432_s19 = sld [smem:[#allocation4 + %s431_s26]] }
  0x75   : > { %478 = vadd.xlane.f32.xlu1 %v467_v0  ;;  %408 = vst [vmem:[#allocation2 + $0x36] sm:$0x1] %v407_v2  ;;  %s411_s25 = scalar_lea.vmem [#allocation5], %s410_s10  ;;  %s437_s6 = sld [smem:[#allocation4 + %s436_s30]] }
  0x76   : > { %v412_v3 = vld [vmem:[%s411_s25] sm:$0x1]  ;;  %s417_s24 = scalar_lea.vmem [#allocation5], %s416_s17  ;;  %s441_s28 = sadd.s32 5, %s1325_s4 }
  0x77   : > { %413 = vst [vmem:[#allocation2 + $0x37] sm:$0x1] %v412_v3  ;;  %v418_v4 = vld [vmem:[%s417_s24] sm:$0x1]  ;;  %s446_s8 = sadd.s32 6, %s1325_s4  ;;  %s442_s9 = sld [smem:[#allocation4 + %s441_s28]] }
  0x78   : > { %420 = vst [vmem:[#allocation2 + $0x38] sm:$0x1] %v418_v4  ;;  %s423_s27 = scalar_lea.vmem [#allocation5], %s422_s3  ;;  %s447_s5 = sld [smem:[#allocation4 + %s446_s8]] }
  0x79   : > { %v424_v5 = vld [vmem:[%s423_s27] sm:$0x1]  ;;  %s428_s7 = scalar_lea.vmem [#allocation5], %s427_s12  ;;  %s451_s11 = sadd.s32 7, %s1325_s4 }
  0x7a   : > { %425 = vst [vmem:[#allocation2 + $0x39] sm:$0x1] %v424_v5  ;;  %v429_v6 = vld [vmem:[%s428_s7] sm:$0x1]  ;;  %s452_s20 = sld [smem:[#allocation4 + %s451_s11]]  ;;  %s433_s10 = scalar_lea.vmem [#allocation5], %s432_s19 }
  0x7b   : > { %430 = vst [vmem:[#allocation2 + $0x3a] sm:$0x1] %v429_v6  ;;  %v434_v7 = vld [vmem:[%s433_s10] sm:$0x1]  ;;  %s438_s29 = scalar_lea.vmem [#allocation5], %s437_s6  ;;  %s118_s12 = sand.u32 1, %s1136_s14  }
  0x7c   : > { %435 = vst [vmem:[#allocation2 + $0x3b] sm:$0x1] %v434_v7  ;;  %v439_v8 = vld [vmem:[%s438_s29] sm:$0x1]  ;;  %s904_s26 = sshll.u32 %s118_s12, 3  ;;  %s923_s30 = sshll.u32 %s1190_s0, 3 }
  0x7d   : > { %440 = vst [vmem:[#allocation2 + $0x3c] sm:$0x1] %v439_v8  ;;  %s443_s17 = scalar_lea.vmem [#allocation5], %s442_s9  ;;  %s771_s6 = scalar_lea.hbm %s1560_s2, %s923_s30 }
  0x7e   : > { %v1339_v9 = vld [vmem:[#allocation2 + $0x30] sm:$0xff]  ;;  %v444_v11 = vld [vmem:[%s443_s17] sm:$0x1]  ;;  %s448_s3 = scalar_lea.vmem [#allocation5], %s447_s5  ;;  %s120_s24 = scalar_lea.vmem [#allocation8], %s904_s26 }
  0x7f   : > { %v470_v10 = vmul.f32 %v1339_v9, %v1339_v9  ;;  %445 = vst [vmem:[#allocation2 + $0x3d] sm:$0x1] %v444_v11  ;;  %v449_v13 = vld [vmem:[%s448_s3] sm:$0x1]  ;;  %s773_s0 = sshll.u32 %s120_s24, 4  ;;  %s775_s28 = sshll.u32 %s771_s6, 4  ;;  %s774_s0 = int_to_ptr.vmem [resolvable:$true] %s773_s0  ;;  %s776_s28 = int_to_ptr.hbm [resolvable:$true] %s775_s28 }
  0x80   : > { %450 = vst [vmem:[#allocation2 + $0x3e] sm:$0x1] %v449_v13  ;;  %s453_s4 = scalar_lea.vmem [#allocation5], %s452_s20  ;;  %s761_s8 = scalar_lea.sflag [#allocation7], %s118_s12 }
  0x81   : > { %484 = vadd.xlane.f32.xlu0 %v470_v10  ;;  %v454_v14 = vld [vmem:[%s453_s4] sm:$0x1]  ;;  %s1090_s9 = sshra.s32 %s776_s28, 4  ;;  %s1096_s11 = scalar_lea.hbm %s1560_s2, 16  ;;  %s1091_s9 = int_to_ptr.hbm [resolvable:$true] %s1090_s9 }
  0x82   : > { %455 = vst [vmem:[#allocation2 + $0x3f] sm:$0x1] %v454_v14  ;;  %s1092_s27 = scalar_lea.hbm %s1091_s9, 8  ;;  %p1097_p2 = scmp.lt.s32.totalorder %s1091_s9, %s1560_s2 }
  0x83   : > { %p1093_p13 = scmp.ne.s32.totalorder %s1091_s9, %s1092_s27  ;;  %p1098_p3 = scmp.lt.s32.totalorder %s1096_s11, %s1092_s27 }
  0x85   : > { %p1094_p0 = pnand %p1093_p13, %p1207_p5  ;;  %p1099_p4 = por %p1098_p3, %p1097_p2 }
  0x87   : > { %p1095_p1 = pneg %p1094_p0 }
  0x89   : > { %v1343_v15 = vld [vmem:[#allocation2 + $0x38] sm:$0xff]  ;;  %p1100_p7 = pnand %p1099_p4, %p1095_p1 }
  0x8a   : > { %v471_v16 = vmul.f32 %v1343_v15, %v1343_v15 }
  0x8c   : > { %486 = vadd.xlane.f32.xlu1 %v471_v16 }
  0xaa   : > { %v473_v17 = vpop.xlane.xlu0 %472 }
  0xab   : > { %v496_v18 = vmax.f32 %v473_v17, 0.0  ;;  %vm488_vm0 = vcmp.gt.f32.partialorder %v473_v17, 0.0 }
  0xac   : > { %v914_v29 = vsel %vm488_vm0, 1.0, %v1150_v28 }
  0xad   : > { %1002 = vrsqrt.f32 %v496_v18  ;;  %v664_v34 = vrot.slane %v914_v29, 4  ;;  %vm510_vm4 = vweird.f32 %v496_v18 }
  0xaf   : > { %v665_v41 = vadd.f32 %v914_v29, %v664_v34 }
  0xb1   : > { %v666_v47 = vrot.slane %v665_v41, 2 }
  0xb3   : > { %v1003_v25 = vpop.eup %1002  ;;  %v667_v54 = vadd.f32 %v666_v47, %v665_v41 }
  0xb4   : > { %v505_v27 = vmul.f32 %v1003_v25, %v496_v18  ;;  %vm511_vm1 = vweird.f32 %v1003_v25 }
  0xb5   : > { %vm512_vm5 = vmor %vm510_vm4, %vm511_vm1  ;;  %v668_v1 = vrot.slane %v667_v54, 1 }
  0xb6   : > { %v1349_v20 = vpop.xlane.xlu2 %480  ;;  %v506_v30 = vmul.f32 %v1003_v25, %v505_v27 }
  0xb7   : > { %v1360_v26 = vmax.f32 %v1349_v20, 0.0  ;;  %vm492_vm2 = vcmp.gt.f32.partialorder %v1349_v20, 0.0  ;;  %v669_v18 = vadd.f32 %v668_v1, %v667_v54 }
  0xb8   : > { %v507_v36 = vmul.f32 0.5, %v506_v30  ;;  %v918_v57 = vsel %vm492_vm2, 1.0, %v1150_v28 }
  0xb9   : > { %v688_v5 = vrot.slane %v918_v57, 4  ;;  %vm550_vm8 = vweird.f32 %v1360_v26 }
  0xba   : > { %v508_v44 = vsub.f32 1.5, %v507_v36 }
  0xbc   : > { %v509_v49 = vmul.f32 %v1003_v25, %v508_v44 }
  0xbe   : > { %v513_v56 = vsel %vm512_vm5, %v1003_v25, %v509_v49  ;;  %v689_v25 = vadd.f32 %v918_v57, %v688_v5 }
  0xbf   : > { %v584_v2 = vsel %vm488_vm0, %v513_v56, 0.0 }
  0xc0   : > { %v592_v11 = vmul.f32 %v584_v2, %v1253_v12 }
  0xc2   : > { %v600_v30 = vrot.slane %v592_v11, 4 }
  0xc3   : > { %v1347_v19 = vpop.xlane.xlu1 %476 }
  0xc4   : > { %v1354_v23 = vmax.f32 %v1347_v19, 0.0  ;;  %vm490_vm6 = vcmp.gt.f32.partialorder %v1347_v19, 0.0 }
  0xc5   : > { %v916_v6 = vsel %vm490_vm6, 1.0, %v1150_v28 }
  0xc6   : > { %vm530_vm11 = vweird.f32 %v1354_v23  ;;  %v676_v14 = vrot.slane %v916_v6, 4 }
  0xcf   : > { %v1351_v22 = vpop.xlane.xlu0 %474 }
  0xd0   : > { %v1357_v24 = vmax.f32 %v1351_v22, 0.0  ;;  %vm489_vm3 = vcmp.gt.f32.partialorder %v1351_v22, 0.0 }
  0xd1   : > { %v915_v59 = vsel %vm489_vm3, 1.0, %v1150_v28 }
  0xd2   : > { %1004 = vrsqrt.f32 %v1357_v24  ;;  %v670_v4 = vrot.slane %v915_v59, 4  ;;  %vm520_vm12 = vweird.f32 %v1357_v24 }
  0xd3   : > { %1006 = vrsqrt.f32 %v1354_v23 }
  0xd4   : > { %1008 = vrsqrt.f32 %v1360_v26  ;;  %v671_v17 = vadd.f32 %v915_v59, %v670_v4 }
  0xd6   : > { %v672_v41 = vrot.slane %v671_v17, 2 }
  0xd8   : > { %v1367_v31 = vpop.eup %1004  ;;  %v673_v19 = vadd.f32 %v672_v41, %v671_v17 }
  0xd9   : > { %v1369_v33 = vpop.eup %1006  ;;  %v515_v37 = vmul.f32 %v1367_v31, %v1357_v24  ;;  %vm521_vm7 = vweird.f32 %v1367_v31 }
  0xda   : > { %v1371_v35 = vpop.eup %1008  ;;  %v525_v39 = vmul.f32 %v1369_v33, %v1354_v23  ;;  %vm531_vm9 = vweird.f32 %v1369_v33  ;;  %vm1422_vm13 = vmor %vm520_vm12, %vm521_vm7  ;;  %v674_v4 = vrot.slane %v673_v19, 1 }
  0xdb   : > { %v545_v43 = vmul.f32 %v1371_v35, %v1360_v26  ;;  %v516_v45 = vmul.f32 %v1367_v31, %v515_v37  ;;  %vm551_vm10 = vweird.f32 %v1371_v35  ;;  %vm1427_vm15 = vmor %vm530_vm11, %vm531_vm9  ;;  %v677_v37 = vadd.f32 %v916_v6, %v676_v14 }
  0xdc   : > { %v1375_v38 = vpop.xlane.xlu2 %482  ;;  %v526_v46 = vmul.f32 %v1369_v33, %v525_v39  ;;  %vm1441_vm0 = vmor %vm550_vm8, %vm551_vm10  ;;  %v712_v26 = vmax.f32 %v669_v18, 1.0  ;;  %v675_v12 = vadd.f32 %v674_v4, %v673_v19 }
  0xdd   : > { %v1380_v40 = vmax.f32 %v1375_v38, 0.0  ;;  %v546_v48 = vmul.f32 %v1371_v35, %v545_v43  ;;  %v517_v50 = vmul.f32 0.5, %v516_v45  ;;  %v690_v43 = vrot.slane %v689_v25, 2 }
  0xde   : > { %v527_v51 = vmul.f32 0.5, %v526_v46  ;;  %v678_v54 = vrot.slane %v677_v37, 2 }
  0xdf   : > { %1010 = vrsqrt.f32 %v1380_v40  ;;  %v547_v55 = vmul.f32 0.5, %v546_v48  ;;  %v518_v58 = vsub.f32 1.5, %v517_v50 }
  0xe0   : > { %v528_v61 = vsub.f32 1.5, %v527_v51  ;;  %v679_v1 = vadd.f32 %v678_v54, %v677_v37 }
  0xe1   : > { %v548_v3 = vsub.f32 1.5, %v547_v55  ;;  %v519_v7 = vmul.f32 %v1367_v31, %v518_v58 }
  0xe2   : > { %v529_v8 = vmul.f32 %v1369_v33, %v528_v61  ;;  %v680_v18 = vrot.slane %v679_v1, 1 }
  0xe3   : > { %v549_v13 = vmul.f32 %v1371_v35, %v548_v3  ;;  %v523_v23 = vsel %vm1422_vm13, %v1367_v31, %v519_v7  ;;  %v1479_v3 = vadd.f32 %v690_v43, %v689_v25 }
  0xe4   : > { %v533_v27 = vsel %vm1427_vm15, %v1369_v33, %v529_v8  ;;  %v585_v39 = vsel %vm489_vm3, %v523_v23, 0.0  ;;  %vm493_vm3 = vcmp.gt.f32.partialorder %v1375_v38, 0.0 }
  0xe5   : > { %v1390_v53 = vpop.eup %1010  ;;  %v553_v33 = vsel %vm1441_vm0, %v1371_v35, %v549_v13  ;;  %v586_v44 = vsel %vm490_vm6, %v533_v27, 0.0  ;;  %v601_v35 = vadd.f32 %v600_v30, %v592_v11  ;;  %v593_v50 = vmul.f32 %v585_v39, %v1299_v42 }
  0xe6   : > { %v555_v62 = vmul.f32 %v1390_v53, %v1380_v40  ;;  %v588_v22 = vsel %vm492_vm2, %v553_v33, 0.0  ;;  %v594_v55 = vmul.f32 %v586_v44, %v1286_v32  ;;  %vm560_vm2 = vweird.f32 %v1380_v40 }
  0xe7   : > { %vm561_vm5 = vweird.f32 %v1390_v53  ;;  %v606_v58 = vrot.slane %v593_v50, 4  ;;  %v919_v59 = vsel %vm493_vm3, 1.0, %v1150_v28  ;;  %v602_v32 = vrot.slane %v601_v35, 2 }
  0xe8   : > { %v1398_v60 = vpop.xlane.xlu1 %478  ;;  %v556_v10 = vmul.f32 %v1390_v53, %v555_v62  ;;  %v596_v62 = vmul.f32 %v588_v22, %v1268_v21  ;;  %vm1483_vm8 = vmor %vm560_vm2, %vm561_vm5  ;;  %v694_v21 = vrot.slane %v919_v59, 4  ;;  %v612_v11 = vrot.slane %v594_v55, 4 }
  0xe9   : > { %v1404_v0 = vmax.f32 %v1398_v60, 0.0  ;;  %vm491_vm14 = vcmp.gt.f32.partialorder %v1398_v60, 0.0  ;;  %v607_v13 = vadd.f32 %v606_v58, %v593_v50  ;;  %v603_v16 = vadd.f32 %v602_v32, %v601_v35 }
  0xea   : > { %v557_v29 = vmul.f32 0.5, %v556_v10  ;;  %v917_v31 = vsel %vm491_vm14, 1.0, %v1150_v28  ;;  %v624_v17 = vrot.slane %v596_v62, 4  ;;  %v695_v60 = vadd.f32 %v919_v59, %v694_v21 }
  0xeb   : > { %1012 = vrsqrt.f32 %v1404_v0  ;;  %v682_v48 = vrot.slane %v917_v31, 4  ;;  %vm540_vm6 = vweird.f32 %v1404_v0  ;;  %v613_v34 = vadd.f32 %v612_v11, %v594_v55 }
  0xec   : > { %v558_v47 = vsub.f32 1.5, %v557_v29  ;;  %v625_v41 = vadd.f32 %v624_v17, %v596_v62  ;;  %v692_v44 = vrot.slane %v1479_v3, 1  ;;  %v681_v35 = vadd.f32 %v680_v18, %v679_v1 }
  0xed   : > { %v683_v42 = vadd.f32 %v917_v31, %v682_v48  ;;  %v604_v19 = vrot.slane %v603_v16, 1  ;;  %vm752_vm2 = vcmask 1045509   ;;  %vm754_vm5 = vcmask 1046534  }
  0xee   : > { %v559_v20 = vmul.f32 %v1390_v53, %v558_v47  ;;  %v626_v55 = vrot.slane %v625_v41, 2  ;;  %v714_v32 = vmax.f32 %v681_v35, 1.0 }
  0xef   : > { %v684_v10 = vrot.slane %v683_v42, 2 }
  0xf1   : > { %v1013_v24 = vpop.eup %1012  ;;  %v685_v29 = vadd.f32 %v684_v10, %v683_v42 }
  0xf2   : > { %v535_v36 = vmul.f32 %v1013_v24, %v1404_v0  ;;  %vm541_vm4 = vweird.f32 %v1013_v24  ;;  %v563_v0 = vsel %vm1483_vm8, %v1390_v53, %v559_v20 }
  0xf3   : > { %vm542_vm7 = vmor %vm540_vm6, %vm541_vm4  ;;  %v589_v23 = vsel %vm493_vm3, %v563_v0, 0.0  ;;  %v686_v47 = vrot.slane %v685_v29, 1  ;;  %vm748_vm3 = vcmask 1043459   ;;  %vm750_vm4 = vcmask 1044484  }
  0xf4   : > { %v536_v45 = vmul.f32 %v1013_v24, %v535_v36  ;;  %v1456_v46 = vpop.xlane.xlu0 %484  ;;  %v608_v36 = vrot.slane %v607_v13, 2  ;;  %v597_v33 = vmul.f32 %v589_v23, %v1314_v52  ;;  %v713_v52 = vmax.f32 %v675_v12, 1.0 }
  0xf5   : > { %vm494_vm1 = vcmp.gt.f32.partialorder %v1456_v46, 0.0  ;;  %v1460_v49 = vmax.f32 %v1456_v46, 0.0  ;;  %v687_v58 = vadd.f32 %v686_v47, %v685_v29  ;;  %vm756_vm6 = vcmask 1047559  }
  0xf6   : > { %v537_v51 = vmul.f32 0.5, %v536_v45  ;;  %v920_v57 = vsel %vm494_vm1, 1.0, %v1150_v28  ;;  %v696_v45 = vrot.slane %v695_v60, 2  ;;  %v609_v22 = vadd.f32 %v608_v36, %v607_v13 }
  0xf7   : > { %1014 = vrsqrt.f32 %v1460_v49  ;;  %v700_v2 = vrot.slane %v920_v57, 4  ;;  %vm570_vm11 = vweird.f32 %v1460_v49  ;;  %v715_v46 = vmax.f32 %v687_v58, 1.0 }
  0xf8   : > { %v538_v56 = vsub.f32 1.5, %v537_v51  ;;  %1016 = vrcp.f32 %v712_v26  ;;  %v630_v51 = vrot.slane %v597_v33, 4  ;;  %v697_v42 = vadd.f32 %v696_v45, %v695_v60 }
  0xf9   : > { %v701_v25 = vadd.f32 %v920_v57, %v700_v2  ;;  %v610_v62 = vrot.slane %v609_v22, 1  ;;  %v627_v13 = vadd.f32 %v626_v55, %v625_v41 }
  0xfa   : > { %v539_v61 = vmul.f32 %v1013_v24, %v538_v56  ;;  %v631_v4 = vadd.f32 %v630_v51, %v597_v33  ;;  %v698_v10 = vrot.slane %v697_v42, 1 }
  0xfb   : > { %v702_v37 = vrot.slane %v701_v25, 2 }
  0xfc   : > { %v543_v6 = vsel %vm542_vm7, %v1013_v24, %v539_v61  ;;  %v632_v18 = vrot.slane %v631_v4, 2  ;;  %v699_v60 = vadd.f32 %v698_v10, %v697_v42 }
  0xfd   : > { %v1015_v7 = vpop.eup %1014  ;;  %v587_v8 = vsel %vm491_vm14, %v543_v6, 0.0  ;;  %v703_v54 = vadd.f32 %v702_v37, %v701_v25  ;;  %v693_v6 = vadd.f32 %v692_v44, %v1479_v3  ;;  %vm744_vm14 = vcmask 1041409  }
  0xfe   : > { %v595_v14 = vmul.f32 %v587_v8, %v1330_v63  ;;  %v565_v40 = vmul.f32 %v1015_v7, %v1460_v49  ;;  %v1502_v30 = vpop.eup %1016  ;;  %vm571_vm10 = vweird.f32 %v1015_v7  ;;  %v605_v8 = vadd.f32 %v604_v19, %v603_v16 }
  0xff   : > { %v1496_v27 = vpop.xlane.xlu1 %486  ;;  %vm572_vm12 = vmor %vm570_vm11, %vm571_vm10  ;;  %v704_v5 = vrot.slane %v703_v54, 1  ;;  %v633_v37 = vadd.f32 %v632_v18, %v631_v4  ;;  %v717_v44 = vmax.f32 %v699_v60, 1.0 }
 0x100   : > { %v618_v53 = vrot.slane %v595_v14, 4  ;;  %v566_v24 = vmul.f32 %v1015_v7, %v565_v40  ;;  %vm495_vm9 = vcmp.gt.f32.partialorder %v1496_v27, 0.0  ;;  %v1500_v63 = vmax.f32 %v1496_v27, 0.0 }
 0x101   : > { %v921_v38 = vsel %vm495_vm9, 1.0, %v1150_v28  ;;  %v614_v28 = vrot.slane %v613_v34, 2  ;;  %v705_v25 = vadd.f32 %v704_v5, %v703_v54  ;;  %v728_v36 = vmul.f32 %v1502_v30, %v605_v8 }
 0x102   : > { %v567_v31 = vmul.f32 0.5, %v566_v24  ;;  %1018 = vrsqrt.f32 %v1500_v63  ;;  %v706_v39 = vrot.slane %v921_v38, 4  ;;  %v619_v26 = vadd.f32 %v618_v53, %v595_v14 }
 0x103   : > { %v615_v2 = vadd.f32 %v614_v28, %v613_v34  ;;  %1020 = vrcp.f32 %v713_v52  ;;  %v611_v14 = vadd.f32 %v610_v62, %v609_v22  ;;  %v716_v24 = vmax.f32 %v693_v6, 1.0 }
 0x104   : > { %v568_v43 = vsub.f32 1.5, %v567_v31  ;;  %v707_v48 = vadd.f32 %v921_v38, %v706_v39  ;;  %v620_v56 = vrot.slane %v619_v26, 2  ;;  %1022 = vrcp.f32 %v714_v32 }
 0x105   : > { %1024 = vrcp.f32 %v715_v46  ;;  %vm580_vm15 = vweird.f32 %v1500_v63  ;;  %v628_v31 = vrot.slane %v627_v13, 1  ;;  %v718_v41 = vmax.f32 %v705_v25, 1.0 }
 0x106   : > { %v569_v50 = vmul.f32 %v1015_v7, %v568_v43  ;;  %v708_v61 = vrot.slane %v707_v48, 2  ;;  %1026 = vrcp.f32 %v716_v24  ;;  %v634_v28 = vrot.slane %v633_v37, 1 }
 0x107   : > { %v629_v35 = vadd.f32 %v628_v31, %v627_v13  ;;  %1028 = vrcp.f32 %v718_v41 }
 0x108   : > { %v573_v57 = vsel %vm572_vm12, %v1015_v7, %v569_v50  ;;  %v1019_v20 = vpop.eup %1018  ;;  %v621_v7 = vadd.f32 %v620_v56, %v619_v26  ;;  %v709_v11 = vadd.f32 %v708_v61, %v707_v48  ;;  %1030 = vrcp.f32 %v717_v44 }
 0x109   : > { %v590_v59 = vsel %vm494_vm1, %v573_v57, 0.0  ;;  %v575_v1 = vmul.f32 %v1019_v20, %v1500_v63  ;;  %vm581_vm13 = vweird.f32 %v1019_v20  ;;  %v1021_v3 = vpop.eup %1020  ;;  %vm746_vm1 = vcmask 1042434  }
 0x10a   : > { %v598_v49 = vmul.f32 %v590_v59, %v1339_v9  ;;  %v616_v9 = vrot.slane %v615_v2, 1  ;;  %v622_v12 = vrot.slane %v621_v7, 1  ;;  %v710_v16 = vrot.slane %v709_v11, 1  ;;  %vm582_vm0 = vmor %vm580_vm15, %vm581_vm13  ;;  %v1023_v43 = vpop.eup %1022 }
 0x10b   : > { %v576_v21 = vmul.f32 %v1019_v20, %v575_v1  ;;  %v729_v29 = vmul.f32 %v1021_v3, %v611_v14  ;;  %v1025_v48 = vpop.eup %1024  ;;  %v635_v57 = vadd.f32 %v634_v28, %v633_v37 }
 0x10c   : > { %v636_v0 = vrot.slane %v598_v49, 4  ;;  %v617_v38 = vadd.f32 %v616_v9, %v615_v2  ;;  %v623_v39 = vadd.f32 %v622_v12, %v621_v7  ;;  %v711_v47 = vadd.f32 %v710_v16, %v709_v11  ;;  %v1027_v56 = vpop.eup %1026 }
 0x10d   : > { %v577_v17 = vmul.f32 0.5, %v576_v21  ;;  %v745_v63 = vsel %vm744_vm14, %v729_v29, %v728_v36  ;;  %v732_v42 = vmul.f32 %v1027_v56, %v629_v35  ;;  %v1029_v58 = vpop.eup %1028 }
 0x10e   : > { %v637_v40 = vadd.f32 %v636_v0, %v598_v49  ;;  %v730_v22 = vmul.f32 %v1023_v43, %v617_v38  ;;  %v731_v52 = vmul.f32 %v1025_v48, %v623_v39  ;;  %v719_v54 = vmax.f32 %v711_v47, 1.0  ;;  %v1031_v61 = vpop.eup %1030 }
 0x10f   : > { %v578_v53 = vsub.f32 1.5, %v577_v17  ;;  %v733_v49 = vmul.f32 %v1031_v61, %v635_v57 }
 0x110   : > { %v638_v23 = vrot.slane %v637_v40, 2  ;;  %v747_v27 = vsel %vm746_vm1, %v730_v22, %v745_v63  ;;  %1032 = vrcp.f32 %v719_v54 }
 0x111   : > { %v579_v34 = vmul.f32 %v1019_v20, %v578_v53 }
 0x112   : > { %v639_v33 = vadd.f32 %v638_v23, %v637_v40 }
 0x113   : > { %v583_v26 = vsel %vm582_vm0, %v1019_v20, %v579_v34 }
 0x114   : > { %v591_v45 = vsel %vm495_vm9, %v583_v26, 0.0  ;;  %v640_v50 = vrot.slane %v639_v33, 1 }
 0x115   : > { %v599_v30 = vmul.f32 %v591_v45, %v1343_v15  ;;  %v749_v15 = vsel %vm748_vm3, %v731_v52, %v747_v27 }
 0x116   : > { %v641_v55 = vadd.f32 %v640_v50, %v639_v33  ;;  %v751_v62 = vsel %vm750_vm4, %v732_v42, %v749_v15  ;;  %v1033_v5 = vpop.eup %1032 }
 0x117   : > { %v642_v51 = vrot.slane %v599_v30, 4  ;;  %v753_v4 = vsel %vm752_vm2, %v733_v49, %v751_v62 }
 0x118   : > { %v734_v32 = vmul.f32 %v1029_v58, %v641_v55 }
 0x119   : > { %v643_v19 = vadd.f32 %v642_v51, %v599_v30 }
 0x11a   : > { %v755_v6 = vsel %vm754_vm5, %v734_v32, %v753_v4 }
 0x11b   : > { %v644_v20 = vrot.slane %v643_v19, 2 }
 0x11d   : > { %v645_v59 = vadd.f32 %v644_v20, %v643_v19 }
 0x11f   : > { %v646_v1 = vrot.slane %v645_v59, 1 }
 0x121   : > { %v647_v2 = vadd.f32 %v646_v1, %v645_v59 }
 0x123   : > { %v735_v7 = vmul.f32 %v1033_v5, %v647_v2 }
 0x125   : > { %v757_v0 = vsel %vm756_vm6, %v735_v7, %v755_v6 }
 0x126   : > { %759 = vst [vmem:[%s120_s24] sm:$0xff] %v757_v0 }
 0x127   : > { %1103 = shalt.err (!%p1100_p7)
}
 0x128   : > { %952 = dma.vmem_to_hbm [thread:$0]  (%p1207_p5), %s774_s0, 128, %s776_s28, %s761_s8  }
 0x129 PF: > { %p964_p8 = scmp.ge.s32.totalorder %s1144_s16, 2  ;;  %s787_s29 = sand.u32 1, %s1132_s13  }
 0x12a   : > { %s788_s17 = scalar_lea.sflag [#allocation7], %s787_s29 }
 0x12b   : > { %p959_p9 = pnand %p964_p8, %p1211_p6 }
 0x12d   : > { %p960_p10 = pneg %p959_p9 }
 0x12f   : > { %1127 = dma.done.wait (%p960_p10), %s788_s17, 128  }
 0x130   : > { %1129 = vsyncadd (%p960_p10), %s788_s17, 4294967168  ;;  %p21_p11 = scmp.ge.s32.totalorder %s1194_s18, 4   ;;  %s1571_s13 = smov %s1136_s14 }
 0x131   : > { %s1572_s14 = smov %s1140_s15  ;;  %s1573_s15 = smov %s1205_s21 }
 0x132   : > { %s1574_s16 = smov %s1194_s18  ;;  %23 = sbr.rel (!%p21_p11) target bundleno = 10 (0xa), region = 132 }
 0x137   :  { %794 = vsyncpa [#allocation6], 1 }
 0x138   :  { %796 = vsyncpa [#allocation6 + $0x1], 1 }
 0x139   :  { %797 = vsyncpa [#allocation7], 1 }
 0x13a   :  { %799 = vsyncpa [#allocation7 + $0x1], 1 }

</bundles_post_ra>
